<compile_context>
chip_gen: v7x
topology: tpu7x:2x2x1
jax: 0.10.0
libtpu: 0.0.40
codegen_flags: <defaults>
</compile_context>

<pallas_src>
import functools

import jax
import jax.numpy as jnp
from jax.experimental import pallas as pl
from jax.experimental.pallas import tpu as pltpu

# ----------------------------- synthetic cfg --------------------------------
SCALE_FACTOR = 2
EMBEDDING = 32
DROPOUT = 0.5          # Dropout is identity in eval mode (see TODO below)
KERNEL_SIZE = 4
STRIDE = 2
BN_EPS = 1e-5          # PyTorch BatchNorm3d default eps

SIDE = 8               # decoder target side
NUM_CHANNELS = 2
BATCH = 2


def build_layer_dims(side, num_channels):
    # replicates Decoder.__init__ layer_dims construction
    dims = [(1, side), (num_channels, side // SCALE_FACTOR)]
    while dims[-1][1] > 3 and len(dims) < 5:
        dims.append((dims[-1][0] * SCALE_FACTOR, dims[-1][1] // SCALE_FACTOR))
    return dims


LAYER_DIMS = build_layer_dims(SIDE, NUM_CHANNELS)          # [(1,8),(2,4),(4,2)]
INPUT_CHANNEL = LAYER_DIMS[-1][0]                          # 4 (bottleneck channels)
INPUT_SIDE = 2                                             # bottleneck side
FC_OUT = INPUT_CHANNEL * INPUT_SIDE ** 3                   # 32
# (Ci, Co) per ConvTranspose3d stage, in execution order of `self.seq`
CONV_STAGES = [(prev[0], curr[0]) for prev, curr in
               zip(reversed(LAYER_DIMS), reversed(LAYER_DIMS[:-1]))]   # [(4,2),(2,1)]


# --------------------------- Pallas kernel (fused) ---------------------------
def _decoder_kernel(*refs, n_stages):
    """Whole decoder forward, single TensorCore, single invocation.

    refs = (z, fc_w, fc_b, M_1, b_1, ..., M_S, b_S, out)
      z    : [N, E]          f32  VMEM
      fc_w : [E, F0]         f32  (stage-1 BN scale folded into columns)
      fc_b : [1, F0]         f32  (stage-1 BN shift folded in)
      M_i  : [F_{i-1}, F_i]  bf16 unrolled ConvTranspose3d matrix
                             (next stage's BN scale folded into columns)
      b_i  : [1, F_i]        f32  (next stage's BN shift; zeros for last stage)
      out  : [N, F_S]        f32  flat NCDHW output
    All operands are 2-D and lane-dense; the matmuls run on the MXU with f32
    accumulation, everything else is a lane-dense VPU elementwise op.
    """
    z_ref, fcw_ref, fcb_ref = refs[0], refs[1], refs[2]
    out_ref = refs[-1]

    # fc3 (+ folded eval-mode BatchNorm3d of stage 1) + ReLU
    x = jnp.dot(z_ref[...], fcw_ref[...],
                preferred_element_type=jnp.float32,
                precision=jax.lax.Precision.HIGHEST) + fcb_ref[...]
    x = jnp.maximum(x, 0.0)
    # TODO(synk): Dropout(cfg.DROPOUT) after fc3 is stochastic in train mode;
    # eval-mode identity here.

    for i in range(n_stages):
        m_ref = refs[3 + 2 * i]
        b_ref = refs[4 + 2 * i]
        y = jnp.dot(x.astype(m_ref.dtype), m_ref[...],
                    preferred_element_type=jnp.float32) + b_ref[...]
        # intermediate stages: folded BN of the next stage + its ReLU;
        # last stage: b == 0 and this ReLU is the trailing ReLU of `self.seq`.
        x = jnp.maximum(y, 0.0)

    out_ref[...] = x


# ------------------------ parameter preparation (one-time) -------------------
def _spread_matrix(in_size, k, stride):
    # P[i, p, o] = 1.0 iff o == stride*i + p  (1-D transposed-conv "spread")
    out_size = (in_size - 1) * stride + k
    i = jnp.arange(in_size)[:, None, None]
    p = jnp.arange(k)[None, :, None]
    o = jnp.arange(out_size)[None, None, :]
    return (o == stride * i + p).astype(jnp.float32)


def unrolled_deconv_matrix(w, side):
    """w: [Ci, Co, K, K, K] -> (M: [Ci*side^3, Co*out_side^3], out_side) with
    flat_out = flat_in @ M reproducing ConvTranspose3d(K, STRIDE, padding=0,
    output_padding=0, bias=False) on NCDHW-flattened tensors."""
    ci, co = w.shape[0], w.shape[1]
    k = w.shape[2]
    p = _spread_matrix(side, k, STRIDE)
    out_side = p.shape[2]
    m = jnp.einsum('uvpqr,dpa,hqb,wrc->udhwvabc', w, p, p, p)
    return m.reshape(ci * side ** 3, co * out_side ** 3), out_side


def prepare_decoder_params(params):
    """One-time repack of the PyTorch-style parameters into MXU-friendly flat
    operands: eval-mode BN folded into matmul columns/bias, conv weights
    unrolled to matrices, big matrices cast to bf16."""
    stages = params["stages"]

    def bn_fold(st):
        scale = st["gamma"] / jnp.sqrt(st["var"] + BN_EPS)
        shift = st["beta"] - st["mean"] * scale
        return scale, shift

    side = INPUT_SIDE
    # fold stage-1 BatchNorm3d into fc3 (per-channel over blocks of side^3)
    s0, t0 = bn_fold(stages[0])
    cs = jnp.repeat(s0, side ** 3)
    ct = jnp.repeat(t0, side ** 3)
    fc_w = (params["fc_w"] * cs[None, :]).astype(jnp.float32)
    fc_b = (params["fc_b"] * cs + ct).reshape(1, -1).astype(jnp.float32)

    mats, biases = [], []
    for i, st in enumerate(stages):
        m, out_side = unrolled_deconv_matrix(st["w"], side)
        ncol = m.shape[1]
        if i + 1 < len(stages):
            s, t = bn_fold(stages[i + 1])
            m = m * jnp.repeat(s, out_side ** 3)[None, :]
            b = jnp.repeat(t, out_side ** 3)
        else:
            b = jnp.zeros((ncol,), jnp.float32)
        # bf16 MXU inputs (f32 accumulation in-kernel); elementwise stays f32.
        mats.append(m.astype(jnp.bfloat16))
        biases.append(b.reshape(1, ncol).astype(jnp.float32))
        side = out_side

    prepared = {"fc_w": fc_w, "fc_b": fc_b, "mats": mats, "biases": biases}
    meta = (int(stages[-1]["w"].shape[1]), int(side))   # (out_channels, out_side)
    return prepared, meta


# ----------------------------- forward (Pallas) ------------------------------
@functools.partial(jax.jit, static_argnames=("out_channels", "out_side"))
def decoder_forward(z, prepared, *, out_channels, out_side):
    mats, biases = prepared["mats"], prepared["biases"]
    n_stages = len(mats)
    operands = [z.astype(jnp.float32), prepared["fc_w"], prepared["fc_b"]]
    for m, b in zip(mats, biases):
        operands += [m, b]
    n = z.shape[0]
    out_cols = mats[-1].shape[1]

    out_flat = pl.pallas_call(
        functools.partial(_decoder_kernel, n_stages=n_stages),
        out_shape=jax.ShapeDtypeStruct((n, out_cols), jnp.float32),
        in_specs=[pl.BlockSpec(memory_space=pltpu.MemorySpace.VMEM)] * len(operands),
        out_specs=pl.BlockSpec(memory_space=pltpu.MemorySpace.VMEM),
    )(*operands)

    # deliver NCDHW (module contract); this single reshape replaces the
    # previous per-stage 8-D XLA transposes.  Output already f32 (`.float()`).
    return out_flat.reshape(n, out_channels, out_side, out_side, out_side)


# ----------------------------- pure-JAX reference ----------------------------
def conv_transpose3d_ref(x, w):
    # ConvTranspose3d(k, s, padding=0, output_padding=0, bias=False)
    wf = jnp.flip(w, axis=(2, 3, 4))
    wf = jnp.transpose(wf, (1, 0, 2, 3, 4))          # [Co, Ci, kd, kh, kw]
    p = KERNEL_SIZE - 1
    return jax.lax.conv_general_dilated(
        x, wf, window_strides=(1, 1, 1), padding=[(p, p)] * 3,
        lhs_dilation=(STRIDE,) * 3, rhs_dilation=(1, 1, 1),
        dimension_numbers=("NCDHW", "OIDHW", "NCDHW"),
        precision=jax.lax.Precision.HIGHEST)


def decoder_reference(z, params):
    h = jnp.dot(z, params["fc_w"],
                precision=jax.lax.Precision.HIGHEST) + params["fc_b"]
    x = h.reshape(z.shape[0], INPUT_CHANNEL, INPUT_SIDE, INPUT_SIDE, INPUT_SIDE)
    bcast = lambda v: v[None, :, None, None, None]
    for st in params["stages"]:
        xn = (x - bcast(st["mean"])) / jnp.sqrt(bcast(st["var"]) + BN_EPS)
        xn = xn * bcast(st["gamma"]) + bcast(st["beta"])
        x = conv_transpose3d_ref(jnp.maximum(xn, 0.0), st["w"])
    return jnp.maximum(x, 0.0).astype(jnp.float32)


# ----------------------------------- main ------------------------------------
if __name__ == "__main__":
    key = jax.random.PRNGKey(0)
    kz, kfw, kfb, kst = jax.random.split(key, 4)

    z = jax.random.normal(kz, (BATCH, EMBEDDING), jnp.float32)

    params = {
        "fc_w": 0.2 * jax.random.normal(kfw, (EMBEDDING, FC_OUT), jnp.float32),
        "fc_b": 0.1 * jax.random.normal(kfb, (FC_OUT,), jnp.float32),
        "stages": [],
    }
    skeys = jax.random.split(kst, len(CONV_STAGES))
    for (ci, co), sk in zip(CONV_STAGES, skeys):
        k1, k2, k3, k4, k5 = jax.random.split(sk, 5)
        params["stages"].append({
            "w": 0.3 * jax.random.normal(
                k1, (ci, co, KERNEL_SIZE, KERNEL_SIZE, KERNEL_SIZE), jnp.float32),
            "gamma": 1.0 + 0.1 * jax.random.normal(k2, (ci,), jnp.float32),
            "beta": 0.1 * jax.random.normal(k3, (ci,), jnp.float32),
            "mean": 0.1 * jax.random.normal(k4, (ci,), jnp.float32),
            "var": jax.random.uniform(k5, (ci,), jnp.float32, 0.5, 1.5),
        })

    # one-time weight repack (BN folding + deconv unrolling + bf16 cast)
    prepared, (out_channels, out_side) = prepare_decoder_params(params)
    prepared = jax.tree_util.tree_map(jax.block_until_ready, prepared)

    out = decoder_forward(z, prepared, out_channels=out_channels,
                          out_side=out_side)
    out = jax.block_until_ready(out)

    # expected output shape: NCDHW with side grown by (s-1)*2 + 4 per stage
    side = INPUT_SIDE
    for _ in CONV_STAGES:
        side = (side - 1) * STRIDE + KERNEL_SIZE
    expected_shape = (BATCH, CONV_STAGES[-1][1], side, side, side)
    assert out.shape == expected_shape, (out.shape, expected_shape)
    assert out.dtype == jnp.float32

    ref = decoder_reference(z, params)
    err = float(jnp.max(jnp.abs(out - ref)))
    scale = max(float(jnp.max(jnp.abs(ref))), 1.0)
    # bf16 conv matrices (per perf guidance) bound the error around ~1e-2*scale;
    # any structural / indexing bug would produce O(scale) errors.
    assert err <= 5e-2 * scale, f"max abs error {err} (scale {scale})"

    print("KERNEL_OK")
</pallas_src>

<mosaic_0001>
module attributes {stable_mosaic.version = 11 : i64} {
  func.func @_decoder_kernel(%arg0: memref<2x32xf32, #tpu.memory_space<vmem>>, %arg1: memref<32x32xf32, #tpu.memory_space<vmem>>, %arg2: memref<1x32xf32, #tpu.memory_space<vmem>>, %arg3: memref<32x432xbf16, #tpu.memory_space<vmem>>, %arg4: memref<1x432xf32, #tpu.memory_space<vmem>>, %arg5: memref<432x2744xbf16, #tpu.memory_space<vmem>>, %arg6: memref<1x2744xf32, #tpu.memory_space<vmem>>, %arg7: memref<2x2744xf32, #tpu.memory_space<vmem>>) attributes {dimension_semantics = [], scalar_prefetch = 0 : i64, scratch_operands = 0 : i64, tpu.core_type = #tpu.core_type<tc>} {
    %c0 = arith.constant 0 : index
    %c0_0 = arith.constant 0 : index
    %0 = vector.load %arg0[%c0, %c0_0] : memref<2x32xf32, #tpu.memory_space<vmem>>, vector<2x32xf32>
    %c0_1 = arith.constant 0 : index
    %c0_2 = arith.constant 0 : index
    %1 = vector.load %arg1[%c0_1, %c0_2] : memref<32x32xf32, #tpu.memory_space<vmem>>, vector<32x32xf32>
    %cst = arith.constant dense<0.000000e+00> : vector<2x32xf32>
    %2 = tpu.matmul %0, %1, %cst {dimension_numbers = #tpu.dot_dimension_numbers<[1], [0], [0], [1], [0, 0, 1, 1], [], []>, precision = #tpu.contract_precision<fp32>} : vector<2x32xf32>, vector<32x32xf32>, vector<2x32xf32> -> vector<2x32xf32>
    %c0_3 = arith.constant 0 : index
    %c0_4 = arith.constant 0 : index
    %3 = vector.load %arg2[%c0_3, %c0_4] : memref<1x32xf32, #tpu.memory_space<vmem>>, vector<1x32xf32>
    %4 = vector.broadcast %3 : vector<1x32xf32> to vector<2x32xf32>
    %5 = arith.addf %2, %4 : vector<2x32xf32>
    %cst_5 = arith.constant 0.000000e+00 : f32
    %6 = vector.broadcast %cst_5 : f32 to vector<2x32xf32>
    %7 = arith.maximumf %5, %6 : vector<2x32xf32>
    %8 = arith.truncf %7 : vector<2x32xf32> to vector<2x32xbf16>
    %c0_6 = arith.constant 0 : index
    %c0_7 = arith.constant 0 : index
    %9 = vector.load %arg3[%c0_6, %c0_7] : memref<32x432xbf16, #tpu.memory_space<vmem>>, vector<32x432xbf16>
    %cst_8 = arith.constant dense<0.000000e+00> : vector<2x432xf32>
    %10 = tpu.matmul %8, %9, %cst_8 {dimension_numbers = #tpu.dot_dimension_numbers<[1], [0], [0], [1], [0, 0, 1, 1], [], []>} : vector<2x32xbf16>, vector<32x432xbf16>, vector<2x432xf32> -> vector<2x432xf32>
    %c0_9 = arith.constant 0 : index
    %c0_10 = arith.constant 0 : index
    %11 = vector.load %arg4[%c0_9, %c0_10] : memref<1x432xf32, #tpu.memory_space<vmem>>, vector<1x432xf32>
    %12 = vector.broadcast %11 : vector<1x432xf32> to vector<2x432xf32>
    %13 = arith.addf %10, %12 : vector<2x432xf32>
    %cst_11 = arith.constant 0.000000e+00 : f32
    %14 = vector.broadcast %cst_11 : f32 to vector<2x432xf32>
    %15 = arith.maximumf %13, %14 : vector<2x432xf32>
    %16 = arith.truncf %15 : vector<2x432xf32> to vector<2x432xbf16>
    %c0_12 = arith.constant 0 : index
    %c0_13 = arith.constant 0 : index
    %17 = vector.load %arg5[%c0_12, %c0_13] : memref<432x2744xbf16, #tpu.memory_space<vmem>>, vector<432x2744xbf16>
    %cst_14 = arith.constant dense<0.000000e+00> : vector<2x2744xf32>
    %18 = tpu.matmul %16, %17, %cst_14 {dimension_numbers = #tpu.dot_dimension_numbers<[1], [0], [0], [1], [0, 0, 1, 1], [], []>} : vector<2x432xbf16>, vector<432x2744xbf16>, vector<2x2744xf32> -> vector<2x2744xf32>
    %c0_15 = arith.constant 0 : index
    %c0_16 = arith.constant 0 : index
    %19 = vector.load %arg6[%c0_15, %c0_16] : memref<1x2744xf32, #tpu.memory_space<vmem>>, vector<1x2744xf32>
    %20 = vector.broadcast %19 : vector<1x2744xf32> to vector<2x2744xf32>
    %21 = arith.addf %18, %20 : vector<2x2744xf32>
    %cst_17 = arith.constant 0.000000e+00 : f32
    %22 = vector.broadcast %cst_17 : f32 to vector<2x2744xf32>
    %23 = arith.maximumf %21, %22 : vector<2x2744xf32>
    %c0_18 = arith.constant 0 : index
    %c0_19 = arith.constant 0 : index
    %24 = vector.load %arg7[%c0_18, %c0_19] : memref<2x2744xf32, #tpu.memory_space<vmem>>, vector<2x2744xf32>
    tpu.vector_store %arg7[%c0_18, %c0_19], %23 {strides = array<i32>} : memref<2x2744xf32, #tpu.memory_space<vmem>>, vector<2x2744xf32>,
    return
  }
}

</mosaic_0001>

<bundles_post_ra>
// kernel: decoder_forward.1
= control target key start
LH: loop header
LB: loop body
LE: loop exit
PB: predicated region body
PF: predicated region fallthrough
CT: control target
= control target key end

     0   :  { %12 = vsyncpa [#allocation3], 0  ;;  %s7775_s0 = inlined_call_operand.hbm [shape: f32[2,32], index: 0, kind: input, shape index: {}]   ;;  %s7776_s1 = inlined_call_operand.hbm [shape: f32[32,32], index: 1, kind: input, shape index: {}]   ;;  %s7777_s2 = inlined_call_operand.hbm [shape: f32[1,32], index: 2, kind: input, shape index: {}]   ;;  %s7778_s3 = inlined_call_operand.hbm [shape: bf16[32,432], index: 3, kind: input, shape index: {}]   ;;  %s7779_s4 = inlined_call_operand.hbm [shape: f32[1,432], index: 4, kind: input, shape index: {}]   ;;  %s7780_s5 = inlined_call_operand.hbm [shape: bf16[432,2744], index: 5, kind: input, shape index: {}]   ;;  %s7781_s6 = inlined_call_operand.hbm [shape: f32[1,2744], index: 6, kind: input, shape index: {}]   ;;  %s7782_s7 = inlined_call_operand.vmem [shape: f32[2,2744], index: 7, kind: output, shape index: {}]  }
   0x1   :  { %13 = vsyncpa [#allocation5], 0 }
   0x2   :  { %14 = vsyncpa [#allocation8], 0 }
   0x3   :  { %15 = vsyncpa [#allocation11], 0  ;;  %s7432_s24 = smov [#allocation4]   ;;  %s7270_s28 = scalar_lea.hbm %s7776_s1, 512 }
   0x4   :  { %s31_s25 = sshll.u32 %s7432_s24, 4  ;;  %p7271_p0 = scmp.ne.s32.totalorder %s7776_s1, %s7270_s28  ;;  %s32_s25 = int_to_ptr.vmem [resolvable:$true] %s31_s25 }
   0x5   :  { %p7274_p1 = scmp.lt.u32.totalorder %s7270_s28, %s7776_s1 }
   0x7   :  { %p7276_p2 = pnand %p7274_p1, %p7271_p0 }
   0x9   :  { %7279 = shalt.err (!%p7276_p2)
}
   0xa   :  { %s7280_s10 = scalar_lea.vmem %s32_s25, 512  ;;  %p7285_p4 = scmp.lt.s32.totalorder %s32_s25, %s32_s25 }
   0xb   :  { %p7281_p3 = scmp.ne.s32.totalorder %s32_s25, %s7280_s10  ;;  %p7286_p5 = scmp.lt.s32.totalorder %s7280_s10, %s7280_s10 }
   0xd   :  { %p7287_p6 = por %p7286_p5, %p7285_p4 }
   0xf   :  { %p7288_p7 = pnand %p7287_p6, %p7281_p3 }
  0x11   :  { %7291 = shalt.err (!%p7288_p7)
}
  0x12   :  { %s7433_s11 = smov 128   ;;  %s7434_s12 = smov 8  }
  0x13   :  { %37 = dma.hbm_to_vmem [thread:$0]  %s7776_s1, 512, %s32_s25, [#allocation5], %s7433_s11, %s7433_s11, %s7434_s12  }
  0x14   :  { %s7435_s15 = smov [#allocation7]   ;;  %s7292_s19 = scalar_lea.hbm %s7778_s3, 1024 }
  0x15   :  { %s53_s16 = sshll.u32 %s7435_s15, 4  ;;  %p7293_p8 = scmp.ne.s32.totalorder %s7778_s3, %s7292_s19  ;;  %s54_s16 = int_to_ptr.vmem [resolvable:$true] %s53_s16 }
  0x16   :  { %p7296_p9 = scmp.lt.u32.totalorder %s7292_s19, %s7778_s3 }
  0x18   :  { %p7298_p10 = pnand %p7296_p9, %p7293_p8 }
  0x1a   :  { %7301 = shalt.err (!%p7298_p10)
}
  0x1b   :  { %s7302_s24 = scalar_lea.vmem %s54_s16, 1024  ;;  %p7307_p12 = scmp.lt.s32.totalorder %s54_s16, %s54_s16 }
  0x1c   :  { %p7303_p11 = scmp.ne.s32.totalorder %s54_s16, %s7302_s24  ;;  %p7308_p13 = scmp.lt.s32.totalorder %s7302_s24, %s7302_s24 }
  0x1e   :  { %p7309_p0 = por %p7308_p13, %p7307_p12 }
  0x20   :  { %p7310_p1 = pnand %p7309_p0, %p7303_p11 }
  0x22   :  { %7313 = shalt.err (!%p7310_p1)
}
  0x23   :  { %s7436_s1 = smov 256   ;;  %s7437_s25 = smov 16  }
  0x24   :  { %59 = dma.hbm_to_vmem [thread:$0]  %s7778_s3, 1024, %s54_s16, [#allocation8], %s7436_s1, %s7436_s1, %s7437_s25  }
  0x25   :  { %s7438_s28 = smov [#allocation10]   ;;  %s7314_s9 = scalar_lea.hbm %s7780_s5, 76032 }
  0x26   :  { %s75_s29 = sshll.u32 %s7438_s28, 4  ;;  %p7315_p2 = scmp.ne.s32.totalorder %s7780_s5, %s7314_s9  ;;  %s76_s29 = int_to_ptr.vmem [resolvable:$true] %s75_s29 }
  0x27   :  { %p7318_p3 = scmp.lt.u32.totalorder %s7314_s9, %s7780_s5 }
  0x29   :  { %p7320_p4 = pnand %p7318_p3, %p7315_p2 }
  0x2b   :  { %7323 = shalt.err (!%p7320_p4)
}
  0x2c   :  { %s7324_s14 = scalar_lea.vmem %s76_s29, 76032  ;;  %p7329_p6 = scmp.lt.s32.totalorder %s76_s29, %s76_s29 }
  0x2d   :  { %p7325_p5 = scmp.ne.s32.totalorder %s76_s29, %s7324_s14  ;;  %p7330_p7 = scmp.lt.s32.totalorder %s7324_s14, %s7324_s14 }
  0x2f   :  { %p7331_p8 = por %p7330_p7, %p7329_p6 }
  0x31   :  { %p7332_p9 = pnand %p7331_p8, %p7325_p5 }
  0x33   :  { %7335 = shalt.err (!%p7332_p9)
}
  0x34   :  { %s7439_s3 = smov 1408   ;;  %s7440_s15 = smov 88  }
  0x35   :  { %81 = dma.hbm_to_vmem [thread:$0]  %s7780_s5, 76032, %s76_s29, [#allocation11], %s7439_s3, %s7439_s3, %s7440_s15  }
  0x36   :  { %s7441_s18 = smov [#allocation2]   ;;  %s7442_s20 = smov [#allocation6]  }
  0x37   :  { %s22_s19 = sshll.u32 %s7441_s18, 4  ;;  %s44_s21 = sshll.u32 %s7442_s20, 4  ;;  %s23_s19 = int_to_ptr.vmem [resolvable:$true] %s22_s19  ;;  %s45_s21 = int_to_ptr.vmem [resolvable:$true] %s44_s21 }
  0x38   :  { %s7336_s24 = scalar_lea.hbm %s7775_s0, 32 }
  0x39   :  { %p7337_p10 = scmp.ne.s32.totalorder %s7775_s0, %s7336_s24  ;;  %p7340_p11 = scmp.lt.u32.totalorder %s7336_s24, %s7775_s0 }
  0x3b   :  { %p7342_p12 = pnand %p7340_p11, %p7337_p10 }
  0x3d   :  { %7345 = shalt.err (!%p7342_p12)
}
  0x3e   :  { %s7346_s5 = scalar_lea.vmem %s23_s19, 32  ;;  %p7351_p0 = scmp.lt.s32.totalorder %s23_s19, %s23_s19 }
  0x3f   :  { %p7347_p13 = scmp.ne.s32.totalorder %s23_s19, %s7346_s5  ;;  %p7352_p1 = scmp.lt.s32.totalorder %s7346_s5, %s7346_s5 }
  0x41   :  { %p7353_p2 = por %p7352_p1, %p7351_p0 }
  0x43   :  { %p7354_p3 = pnand %p7353_p2, %p7347_p13 }
  0x45   :  { %7357 = shalt.err (!%p7354_p3)
}
  0x46   :  { %25 = dma.hbm_to_vmem [thread:$0]  %s7775_s0, 32, %s23_s19, [#allocation3]  }
  0x47   :  { %s7358_s9 = scalar_lea.hbm %s7777_s2, 16 }
  0x48   :  { %p7359_p4 = scmp.ne.s32.totalorder %s7777_s2, %s7358_s9  ;;  %p7362_p5 = scmp.lt.u32.totalorder %s7358_s9, %s7777_s2 }
  0x4a   :  { %p7364_p6 = pnand %p7362_p5, %p7359_p4 }
  0x4c   :  { %7367 = shalt.err (!%p7364_p6)
}
  0x4d   :  { %s7368_s14 = scalar_lea.vmem %s45_s21, 16  ;;  %s7372_s3 = scalar_lea.vmem %s45_s21, 32 }
  0x4e   :  { %p7369_p7 = scmp.ne.s32.totalorder %s45_s21, %s7368_s14  ;;  %p7373_p8 = scmp.lt.s32.totalorder %s45_s21, %s45_s21 }
  0x4f   :  { %p7374_p9 = scmp.lt.s32.totalorder %s7372_s3, %s7368_s14 }
  0x51   :  { %p7375_p10 = por %p7374_p9, %p7373_p8 }
  0x53   :  { %p7376_p11 = pnand %p7375_p10, %p7369_p7 }
  0x55   :  { %7379 = shalt.err (!%p7376_p11)
}
  0x56   :  { %47 = dma.hbm_to_vmem [thread:$0]  %s7777_s2, 16, %s45_s21, [#allocation5]  }
  0x57   :  { %s7443_s16 = smov [#allocation9]   ;;  %s7444_s18 = smov [#allocation12]  }
  0x58   :  { %s66_s17 = sshll.u32 %s7443_s16, 4  ;;  %s88_s19 = sshll.u32 %s7444_s18, 4  ;;  %s67_s17 = int_to_ptr.vmem [resolvable:$true] %s66_s17  ;;  %s89_s19 = int_to_ptr.vmem [resolvable:$true] %s88_s19 }
  0x59   :  { %s7380_s23 = scalar_lea.hbm %s7779_s4, 64 }
  0x5a   :  { %p7381_p12 = scmp.ne.s32.totalorder %s7779_s4, %s7380_s23  ;;  %p7384_p13 = scmp.lt.u32.totalorder %s7380_s23, %s7779_s4 }
  0x5c   :  { %p7386_p0 = pnand %p7384_p13, %p7381_p12 }
  0x5e   :  { %7389 = shalt.err (!%p7386_p0)
}
  0x5f   :  { %s7390_s2 = scalar_lea.vmem %s67_s17, 64  ;;  %p7395_p2 = scmp.lt.s32.totalorder %s67_s17, %s67_s17 }
  0x60   :  { %p7391_p1 = scmp.ne.s32.totalorder %s67_s17, %s7390_s2  ;;  %p7396_p3 = scmp.lt.s32.totalorder %s7390_s2, %s7390_s2 }
  0x62   :  { %p7397_p4 = por %p7396_p3, %p7395_p2 }
  0x64   :  { %p7398_p5 = pnand %p7397_p4, %p7391_p1 }
  0x66   :  { %7401 = shalt.err (!%p7398_p5)
}
  0x67   :  { %69 = dma.hbm_to_vmem [thread:$0]  %s7779_s4, 64, %s67_s17, [#allocation8]  }
  0x68   :  { %s7402_s29 = scalar_lea.hbm %s7781_s6, 352 }
  0x69   :  { %p7403_p6 = scmp.ne.s32.totalorder %s7781_s6, %s7402_s29  ;;  %p7406_p7 = scmp.lt.u32.totalorder %s7402_s29, %s7781_s6 }
  0x6b   :  { %p7408_p8 = pnand %p7406_p7, %p7403_p6 }
  0x6d   :  { %7411 = shalt.err (!%p7408_p8)
}
  0x6e   :  { %s7412_s11 = scalar_lea.vmem %s89_s19, 352  ;;  %p7417_p10 = scmp.lt.s32.totalorder %s89_s19, %s89_s19 }
  0x6f   :  { %p7413_p9 = scmp.ne.s32.totalorder %s89_s19, %s7412_s11  ;;  %p7418_p11 = scmp.lt.s32.totalorder %s7412_s11, %s7412_s11 }
  0x71   :  { %p7419_p12 = por %p7418_p11, %p7417_p10 }
  0x73   :  { %p7420_p13 = pnand %p7419_p12, %p7413_p9 }
  0x75   :  { %7423 = shalt.err (!%p7420_p13)
}
  0x76   :  { %91 = dma.hbm_to_vmem [thread:$0]  %s7781_s6, 352, %s89_s19, [#allocation11]  }
  0x77   :  { %7424 = dma.done.wait [#allocation3], 32  }
  0x78   :  { %7425 = vsyncadd [#allocation3], 4294967264 }
  0x79   :  { %7426 = dma.done.wait [#allocation5], 528  }
  0x7a   :  { %7427 = vsyncadd [#allocation5], 4294966768 }
  0x7b   :  { %7428 = dma.done.wait [#allocation8], 1088  }
  0x7c   :  { %7429 = vsyncadd [#allocation8], 4294966208 }
  0x7d   :  { %7430 = dma.done.wait [#allocation11], 76384  }
  0x7e   :  { %7431 = vsyncadd [#allocation11], 4294890912  ;;  %v7445_v0 = vmov 0.0|0.0   ;;  %vm7446_vm0 = vmmov 0   ;;  %v7447_v1 = vmov 0.0   ;;  %vm126_vm1 = vcmask 261120  }
  0x7f   :  { %6244 = vmatprep.subr.bf16.mxu0 %v7445_v0  ;;  %6191 = vmatprep.mubr.msk.f32.mxu0 %vm7446_vm0, %v7447_v1  ;;  %v115_v2 = vld [vmem:[#allocation4] sm:$0xff]  ;;  %v116_v3 = vld [vmem:[#allocation4 + $0x8] sm:$0xff]  ;;  %v117_v4 = vld [vmem:[#allocation4 + $0x10] sm:$0xff]  ;;  %v7448_v46 = vmov 0   ;;  %vm4460_vm2 = vcmask 392192   ;;  %vm5514_vm3 = vcmask 1041408  }
  0x80   :  { %6238 = vmatprep.subr.bf16.mxu1 %v7445_v0  ;;  %6180 = vmatprep.mubr.msk.f32.mxu1 %vm7446_vm0, %v7447_v1  ;;  %v131_v5 = vand.u32 4294901760, %v115_v2  ;;  %v134_v6 = vand.u32 4294901760, %v116_v3  ;;  %v118_v7 = vld [vmem:[#allocation4 + $0x18] sm:$0xff]  ;;  %v137_v8 = vand.u32 4294901760, %v117_v4  ;;  %v6366_v41 = vld [vmem:[#allocation7] ss:$16 sps:$4 sm:$0xff]  }
  0x81   :  { %v114_v9 = vld [vmem:[#allocation2] sm:$0x3]  ;;  %v140_v10 = vand.u32 4294901760, %v118_v7  ;;  %v6368_v42 = vld [vmem:[#allocation7 + $0x4] ss:$16 sps:$4 sm:$0xff]   ;;  %vm5515_vm4 = vcmask 453634  }
  0x82   :  { %v128_v11 = vsel %vm126_vm1, %v114_v9, 0  ;;  %v211_v12 = vsub.f32 %v115_v2, %v131_v5  ;;  %v218_v13 = vsub.f32 %v116_v3, %v134_v6  ;;  %v225_v14 = vsub.f32 %v117_v4, %v137_v8  ;;  %v6371_v43 = vld [vmem:[#allocation7 + $0x24] ss:$16 sps:$4 sm:$0xff]   ;;  %v6369_v44 = vld [vmem:[#allocation7 + $0x20] ss:$16 sps:$4 sm:$0xff]   ;;  %vm5516_vm5 = vmor %vm5515_vm4, %vm5514_vm3 }
  0x83   :  { %v232_v15 = vsub.f32 %v118_v7, %v140_v10  ;;  %v199_v16 = vand.u32 4294901760, %v128_v11  ;;  %v6239_v17 = vpack.c.bf16 %v134_v6, %v131_v5  ;;  %v6242_v27 = vpack.c.bf16 %v140_v10, %v137_v8  ;;  %v6374_v45 = vld [vmem:[#allocation7 + $0xc] ss:$16 sps:$4 sm:$0xff]   ;;  %v6404_v48 = vld [vmem:[#allocation10 + $0xb04] ss:$88 sps:$4 sm:$0xff]  }
  0x84   :  { %v212_v18 = vand.u32 4294901760, %v211_v12  ;;  %v219_v19 = vand.u32 4294901760, %v218_v13  ;;  %v226_v20 = vand.u32 4294901760, %v225_v14  ;;  %v6251_v37 = vpack.c.bf16 %v218_v13, %v211_v12  ;;  %v6402_v47 = vld [vmem:[#allocation10 + $0xb00] ss:$88 sps:$4 sm:$0xff]  }
  0x85   :  { %v233_v21 = vand.u32 4294901760, %v232_v15  ;;  %v200_v22 = vsub.f32 %v128_v11, %v199_v16  ;;  %6240 = vmatpush3.bf16.msra.mxu1 %v6239_v17  ;;  %v6254_v38 = vpack.c.bf16 %v232_v15, %v225_v14  ;;  %v6408_v49 = vld [vmem:[#allocation10 + $0xbb0] ss:$88 sps:$4 sm:$0xff]   ;;  %v6410_v50 = vld [vmem:[#allocation10 + $0xbb4] ss:$88 sps:$4 sm:$0xff]  }
  0x86   :  { %v213_v23 = vsub.f32 %v211_v12, %v212_v18  ;;  %v220_v24 = vsub.f32 %v218_v13, %v219_v19  ;;  %v227_v25 = vsub.f32 %v225_v14, %v226_v20  ;;  %6241 = vmatprep.subr.bf16.mxu1 %v7445_v0  ;;  %v6263_v39 = vpack.c.bf16 %v219_v19, %v212_v18  ;;  %v6414_v51 = vld [vmem:[#allocation10 + $0xc60] ss:$88 sps:$4 sm:$0xff]   ;;  %v6416_v52 = vld [vmem:[#allocation10 + $0xc64] ss:$88 sps:$4 sm:$0xff]   ;;  %v6420_v53 = vld [vmem:[#allocation10 + $0xd10] ss:$88 sps:$4 sm:$0xff]  }
  0x87   :  { %v234_v26 = vsub.f32 %v232_v15, %v233_v21  ;;  %v201_v28 = vand.u32 4294901760, %v200_v22  ;;  %v6266_v40 = vpack.c.bf16 %v233_v21, %v226_v20  ;;  %v6422_v54 = vld [vmem:[#allocation10 + $0xd14] ss:$88 sps:$4 sm:$0xff]   ;;  %v6426_v55 = vld [vmem:[#allocation10 + $0xdc0] ss:$88 sps:$4 sm:$0xff]  }
  0x88   :  { %v214_v29 = vand.u32 4294901760, %v213_v23  ;;  %v221_v30 = vand.u32 4294901760, %v220_v24  ;;  %v228_v31 = vand.u32 4294901760, %v227_v25  ;;  %v6428_v56 = vld [vmem:[#allocation10 + $0xdc4] ss:$88 sps:$4 sm:$0xff]  }
  0x89   :  { %v235_v32 = vand.u32 4294901760, %v234_v26  ;;  %6243 = vmatpush3.bf16.msra.mxu1 %v6242_v27  ;;  %v202_v33 = vsub.f32 %v200_v22, %v201_v28  ;;  %v6432_v57 = vld [vmem:[#allocation10 + $0xe70] ss:$88 sps:$4 sm:$0xff]   ;;  %v6434_v58 = vld [vmem:[#allocation10 + $0xe74] ss:$88 sps:$4 sm:$0xff]  }
  0x8a   :  { %v6245_v34 = vpack.c.bf16 %v221_v30, %v214_v29  ;;  %690 = vmatprep.subr.bf16.mxu1 %v6368_v42  ;;  %v6438_v59 = vld [vmem:[#allocation10 + $0xf20] ss:$88 sps:$4 sm:$0xff]   ;;  %v6440_v60 = vld [vmem:[#allocation10 + $0xf24] ss:$88 sps:$4 sm:$0xff]   ;;  %v6383_v11 = vld [vmem:[#allocation10 + $0xb4] ss:$88 sps:$4 sm:$0xff]  }
  0x8b   :  { %v203_v35 = vand.u32 4294901760, %v202_v33  ;;  %v6248_v36 = vpack.c.bf16 %v235_v32, %v228_v31  ;;  %v5526_v63 = vld [vmem:[#allocation6] ss:$0 sm:$0xff]  ;;  %v6372_v5 = vld [vmem:[#allocation7 + $0x8] ss:$16 sps:$4 sm:$0xff]  }
  0x8c   :  { %6246 = vmatpush3.bf16.msra.mxu0 %v6245_v34  ;;  %v6377_v7 = vld [vmem:[#allocation7 + $0x2c] ss:$16 sps:$4 sm:$0xff]   ;;  %v6375_v8 = vld [vmem:[#allocation7 + $0x28] ss:$16 sps:$4 sm:$0xff]  }
  0x8d   :  { %6247 = vmatprep.subr.bf16.mxu0 %v7445_v0  ;;  %6181 = vmatmul.mubr.f32.vlgmr.msra.gmra.mrb[0].mxu1 %v203_v35  ;;  %v6380_v9 = vld [vmem:[#allocation10 + $0x4] ss:$88 sps:$4 sm:$0xff]   ;;  %v6378_v10 = vld [vmem:[#allocation10] ss:$88 sps:$4 sm:$0xff]   ;;  %v6381_v12 = vld [vmem:[#allocation10 + $0xb0] ss:$88 sps:$4 sm:$0xff]  }
  0x8e   :  { %691 = vmatpush1.bf16.msra.mxu1 %v6366_v41  ;;  %722 = vmatprep.mubr.bf16.mxu1 %v7448_v46  ;;  %v6386_v13 = vld [vmem:[#allocation10 + $0x164] ss:$88 sps:$4 sm:$0xff]   ;;  %v6384_v14 = vld [vmem:[#allocation10 + $0x160] ss:$88 sps:$4 sm:$0xff]   ;;  %v6389_v15 = vld [vmem:[#allocation10 + $0x214] ss:$88 sps:$4 sm:$0xff]  }
  0x8f   :  { %692 = vmatprep.subr.bf16.mxu1 %v6371_v43  ;;  %v6390_v18 = vld [vmem:[#allocation10 + $0x2c0] ss:$88 sps:$4 sm:$0xff]   ;;  %v6395_v19 = vld [vmem:[#allocation10 + $0x374] ss:$88 sps:$4 sm:$0xff]   ;;  %v6393_v20 = vld [vmem:[#allocation10 + $0x370] ss:$88 sps:$4 sm:$0xff]  }
  0x90   :  { %6249 = vmatpush3.bf16.msra.mxu0 %v6248_v36  ;;  %v6398_v21 = vld [vmem:[#allocation10 + $0x424] ss:$88 sps:$4 sm:$0xff]   ;;  %v6401_v23 = vld [vmem:[#allocation10 + $0x4d4] ss:$88 sps:$4 sm:$0xff]   ;;  %v6399_v24 = vld [vmem:[#allocation10 + $0x4d0] ss:$88 sps:$4 sm:$0xff]  }
  0x91   :  { %6250 = vmatprep.subr.bf16.mxu0 %v7445_v0  ;;  %v6407_v25 = vld [vmem:[#allocation10 + $0x584] ss:$88 sps:$4 sm:$0xff]   ;;  %v6405_v26 = vld [vmem:[#allocation10 + $0x580] ss:$88 sps:$4 sm:$0xff]   ;;  %v6425_v31 = vld [vmem:[#allocation10 + $0x794] ss:$88 sps:$4 sm:$0xff]  }
  0x92   :  { %693 = vmatpush1.bf16.msra.mxu1 %v6369_v44  ;;  %v6419_v29 = vld [vmem:[#allocation10 + $0x6e4] ss:$88 sps:$4 sm:$0xff]   ;;  %v6417_v30 = vld [vmem:[#allocation10 + $0x6e0] ss:$88 sps:$4 sm:$0xff]   ;;  %v6423_v32 = vld [vmem:[#allocation10 + $0x790] ss:$88 sps:$4 sm:$0xff]  }
  0x93   :  { %6192 = vmatmul.mubr.f32.vlgmr.msra.gmra.mrb[0].mxu0 %v199_v16  ;;  %731 = vmatprep.subr.bf16.mxu1 %v6374_v45  ;;  %v6431_v33 = vld [vmem:[#allocation10 + $0x844] ss:$88 sps:$4 sm:$0xff]   ;;  %v6429_v34 = vld [vmem:[#allocation10 + $0x840] ss:$88 sps:$4 sm:$0xff]   ;;  %v6437_v35 = vld [vmem:[#allocation10 + $0x8f4] ss:$88 sps:$4 sm:$0xff]  }
  0x94   :  { %6252 = vmatpush3.bf16.msra.mxu0 %v6251_v37  ;;  %6202 = vmatprep.mubr.msk.f32.mxu0 %vm7446_vm0, %v7447_v1  ;;  %v6435_v36 = vld [vmem:[#allocation10 + $0x8f0] ss:$88 sps:$4 sm:$0xff]   ;;  %v6443_v37 = vld [vmem:[#allocation10 + $0x9a4] ss:$88 sps:$4 sm:$0xff]   ;;  %v6449_v41 = vld [vmem:[#allocation10 + $0xa54] ss:$88 sps:$4 sm:$0xff]  }
  0x95   :  { %6253 = vmatprep.subr.bf16.mxu0 %v7445_v0  ;;  %v6452_v42 = vld [vmem:[#allocation10 + $0x1084] ss:$88 sps:$4 sm:$0xff]   ;;  %v6447_v43 = vld [vmem:[#allocation10 + $0xa50] ss:$88 sps:$4 sm:$0xff]   ;;  %v6450_v44 = vld [vmem:[#allocation10 + $0x1080] ss:$88 sps:$4 sm:$0xff]  }
  0x96   :  { %v6455_v45 = vld [vmem:[#allocation10 + $0x1134] ss:$88 sps:$4 sm:$0xff]  }
  0x98   :  { %6255 = vmatpush3.bf16.msra.mxu0 %v6254_v38  ;;  %v6446_v38 = vld [vmem:[#allocation10 + $0xfd4] ss:$88 sps:$4 sm:$0xff]  }
  0x99   :  { %6256 = vmatprep.subr.bf16.mxu0 %v7445_v0 }
  0x9b   :  { %6203 = vmatmul.mubr.f32.vlgmr.msra.gmra.mrb[0].mxu0 %v200_v22  ;;  %v6396_v22 = vld [vmem:[#allocation10 + $0x420] ss:$88 sps:$4 sm:$0xff]  }
  0x9c   :  { %6258 = vmatpush3.bf16.msra.mxu0 %v6239_v17  ;;  %6213 = vmatprep.mubr.msk.f32.mxu0 %vm7446_vm0, %v7447_v1 }
  0x9d   :  { %6259 = vmatprep.subr.bf16.mxu0 %v7445_v0 }
  0xa0   :  { %6261 = vmatpush3.bf16.msra.mxu0 %v6242_v27 }
  0xa1   :  { %6262 = vmatprep.subr.bf16.mxu0 %v7445_v0 }
  0xa3   :  { %6214 = vmatmul.mubr.f32.vlgmr.msra.gmra.mrb[0].mxu0 %v201_v28  ;;  %v6411_v28 = vld [vmem:[#allocation10 + $0x630] ss:$88 sps:$4 sm:$0xff]  }
  0xa4   :  { %6264 = vmatpush3.bf16.msra.mxu0 %v6263_v39  ;;  %6224 = vmatprep.mubr.msk.f32.mxu0 %vm7446_vm0, %v7447_v1  ;;  %v6441_v39 = vld [vmem:[#allocation10 + $0x9a0] ss:$88 sps:$4 sm:$0xff]  }
  0xa5   :  { %6265 = vmatprep.subr.bf16.mxu0 %v7445_v0 }
  0xa8   :  { %6267 = vmatpush3.bf16.msra.mxu0 %v6266_v40  ;;  %v6444_v40 = vld [vmem:[#allocation10 + $0xfd0] ss:$88 sps:$4 sm:$0xff]  }
  0xa9   :  { %6268 = vmatprep.subr.bf16.mxu0 %v7445_v0 }
  0xab   :  { %6225 = vmatmul.mubr.f32.vlgmr.msra.gmra.mrb[0].mxu0 %v199_v16 }
  0xac   :  { %6270 = vmatpush3.bf16.msra.mxu0 %v6239_v17  ;;  %6235 = vmatprep.mubr.msk.f32.mxu0 %vm7446_vm0, %v7447_v1  ;;  %v6392_v17 = vld [vmem:[#allocation10 + $0x2c4] ss:$88 sps:$4 sm:$0xff]  }
  0xad   :  { %6271 = vmatprep.subr.bf16.mxu0 %v7445_v0 }
  0xb0   :  { %6273 = vmatpush3.bf16.msra.mxu0 %v6242_v27  ;;  %v6413_v27 = vld [vmem:[#allocation10 + $0x634] ss:$88 sps:$4 sm:$0xff]  }
  0xb1   :  { %4505 = vmatprep.subr.bf16.mxu0 %v6404_v48  ;;  %v6461_v48 = vld [vmem:[#allocation10 + $0x11e4] ss:$88 sps:$4 sm:$0xff]  }
  0xb3   :  { %6236 = vmatmul.mubr.f32.vlgmr.msra.gmra.mrb[0].mxu0 %v199_v16  ;;  %v6387_v16 = vld [vmem:[#allocation10 + $0x210] ss:$88 sps:$4 sm:$0xff]  }
  0xb4   :  { %4506 = vmatpush1.bf16.msra.mxu0 %v6402_v47  ;;  %v6453_v47 = vld [vmem:[#allocation10 + $0x1130] ss:$88 sps:$4 sm:$0xff]  }
  0xb5   :  { %4507 = vmatprep.subr.bf16.mxu0 %v6410_v50  ;;  %v6467_v50 = vld [vmem:[#allocation10 + $0xc] ss:$88 sps:$4 sm:$0xff]  }
  0xb8   :  { %4508 = vmatpush1.bf16.msra.mxu0 %v6408_v49  ;;  %v6459_v49 = vld [vmem:[#allocation10 + $0x11e0] ss:$88 sps:$4 sm:$0xff]  }
  0xb9   :  { %4509 = vmatprep.subr.bf16.mxu0 %v6416_v52 }
  0xbc   :  { %4510 = vmatpush1.bf16.msra.mxu0 %v6414_v51  ;;  %v627_v51 = vlaneseq }
  0xbd   :  { %4511 = vmatprep.subr.bf16.mxu0 %v6422_v54  ;;  %v625_v54 = vld [vmem:[#allocation9] sm:$0xf] }
  0xbe   :  { %v7601_v52 = vshrl.u32 %v627_v51, 7  ;;  %v6510_v51 = vld [vmem:[#allocation10 + $0x640] ss:$88 sps:$4 sm:$0xff]  }
  0xc0   :  { %4512 = vmatpush1.bf16.msra.mxu0 %v6420_v53  ;;  %v7604_v53 = vsub.s32 0, %v7601_v52 }
  0xc1   :  { %4513 = vmatprep.subr.bf16.mxu0 %v6428_v56 }
  0xc2   :  { %v630_v56 = vrot.slane %v625_v54, %v7604_v53 }
  0xc4   :  { %4514 = vmatpush1.bf16.msra.mxu0 %v6426_v55  ;;  %v7607_v55 = vsub.s32 1, %v7601_v52 }
  0xc5   :  { %4515 = vmatprep.subr.bf16.mxu0 %v6434_v58 }
  0xc8   :  { %4516 = vmatpush1.bf16.msra.mxu0 %v6432_v57  ;;  %v634_v57 = vrot.slane %v625_v54, %v7607_v55 }
  0xc9   :  { %4517 = vmatprep.subr.bf16.mxu0 %v6440_v60 }
  0xcc   :  { %4518 = vmatpush1.bf16.msra.mxu0 %v6438_v59 }
  0xcd   :  { %4519 = vmatprep.subr.bf16.mxu0 %v6446_v38  ;;  %v6489_v38 = vld [vmem:[#allocation10 + $0x2c8] ss:$88 sps:$4 sm:$0xff]  }
  0xd0   :  { %4520 = vmatpush1.bf16.msra.mxu0 %v6444_v40  ;;  %v6497_v40 = vld [vmem:[#allocation10 + $0x37c] ss:$88 sps:$4 sm:$0xff]  }
  0xd1   :  { %4521 = vmatprep.subr.bf16.mxu0 %v6452_v42  ;;  %v6495_v42 = vld [vmem:[#allocation10 + $0x378] ss:$88 sps:$4 sm:$0xff]  }
  0xd4   :  { %4522 = vmatpush1.bf16.msra.mxu0 %v6450_v44  ;;  %v6503_v44 = vld [vmem:[#allocation10 + $0x42c] ss:$88 sps:$4 sm:$0xff]  }
  0xd5   :  { %4523 = vmatprep.subr.bf16.mxu0 %v6455_v45  ;;  %v6506_v45 = vld [vmem:[#allocation10 + $0x594] ss:$88 sps:$4 sm:$0xff]  }
  0xd8   :  { %4524 = vmatpush1.bf16.msra.mxu0 %v6453_v47  ;;  %v6504_v47 = vld [vmem:[#allocation10 + $0x590] ss:$88 sps:$4 sm:$0xff]  }
  0xd9   :  { %4525 = vmatprep.subr.bf16.mxu0 %v6461_v48  ;;  %v6509_v48 = vld [vmem:[#allocation10 + $0x4dc] ss:$88 sps:$4 sm:$0xff]  }
  0xdc   :  { %4526 = vmatpush1.bf16.msra.mxu0 %v6459_v49  ;;  %v6512_v49 = vld [vmem:[#allocation10 + $0x644] ss:$88 sps:$4 sm:$0xff]  }
  0xdd   :  { %4546 = vmatprep.subr.bf16.mxu0 %v6467_v50  ;;  %v6507_v50 = vld [vmem:[#allocation10 + $0x4d8] ss:$88 sps:$4 sm:$0xff]  }
 0x160   :  { %v205_v61 = vpop.f32.mrb[0].mxu1 }
 0x161   :  { %v6182_v62 = vpop.f32.mrb[1].mxu1  ;;  %v206_v0 = vadd.f32 %v5526_v63, %v205_v61  ;;  %v7612_v61 = vsub.s32 2, %v7601_v52 }
 0x186   :  { %v611_v1 = vpop.f32.mrb[0].mxu0 }
 0x187   :  { %v6275_v2 = vadd.f32 %v611_v1, %v206_v0  ;;  %v6237_v3 = vpop.f32.mrb[1].mxu0  ;;  %v7615_v0 = vsub.s32 3, %v7601_v52 }
 0x189   :  { %v615_v4 = vmax.f32 %v6275_v2, 0.0 }
 0x18b   :  { %v616_v6 = vpack.c.bf16 %v615_v4, %v615_v4  ;;  %v638_v4 = vrot.slane %v625_v54, %v7612_v61 }
 0x18d   :  { %5535 = vmatmul.mubr.msk.bf16.vlgmr.msra.gmra.mrb[4].mxu1 %vm126_vm1, %v616_v6 }
 0x18e   :  { %732 = vmatpush1.bf16.msra.mxu1 %v6372_v5  ;;  %763 = vmatprep.mubr.bf16.mxu1 %v7448_v46  ;;  %v6458_v46 = vld [vmem:[#allocation10 + $0x14] ss:$88 sps:$4 sm:$0xff]  }
 0x18f   :  { %733 = vmatprep.subr.bf16.mxu1 %v6377_v7  ;;  %v642_v7 = vrot.slane %v625_v54, %v7615_v0  ;;  %v6515_v54 = vld [vmem:[#allocation10 + $0x58c] ss:$88 sps:$4 sm:$0xff]  }
 0x192   :  { %734 = vmatpush1.bf16.msra.mxu1 %v6375_v8 }
 0x193   :  { %4464 = vmatprep.subr.bf16.mxu1 %v6380_v9  ;;  %v6464_v9 = vld [vmem:[#allocation10 + $0xc4] ss:$88 sps:$4 sm:$0xff]  }
 0x195   :  { %5536 = vmatmul.mubr.msk.bf16.vlgmr.msra.gmra.mrb[8].mxu1 %vm126_vm1, %v616_v6  ;;  %v6456_v6 = vld [vmem:[#allocation10 + $0x10] ss:$88 sps:$4 sm:$0xff]  }
 0x196   :  { %4465 = vmatpush1.bf16.msra.mxu1 %v6378_v10 }
 0x197   :  { %4466 = vmatprep.subr.bf16.mxu1 %v6383_v11 }
 0x19a   :  { %4467 = vmatpush1.bf16.msra.mxu1 %v6381_v12 }
 0x19b   :  { %4468 = vmatprep.subr.bf16.mxu1 %v6386_v13 }
 0x19e   :  { %4469 = vmatpush1.bf16.msra.mxu1 %v6384_v14 }
 0x19f   :  { %4470 = vmatprep.subr.bf16.mxu1 %v6389_v15  ;;  %v6462_v15 = vld [vmem:[#allocation10 + $0xc0] ss:$88 sps:$4 sm:$0xff]  }
 0x1a2   :  { %4471 = vmatpush1.bf16.msra.mxu1 %v6387_v16 }
 0x1a3   :  { %4472 = vmatprep.subr.bf16.mxu1 %v6392_v17 }
 0x1a6   :  { %4473 = vmatpush1.bf16.msra.mxu1 %v6390_v18  ;;  %v6470_v18 = vld [vmem:[#allocation10 + $0x174] ss:$88 sps:$4 sm:$0xff]  }
 0x1a7   :  { %4474 = vmatprep.subr.bf16.mxu1 %v6395_v19 }
 0x1aa   :  { %4475 = vmatpush1.bf16.msra.mxu1 %v6393_v20 }
 0x1ab   :  { %4476 = vmatprep.subr.bf16.mxu1 %v6398_v21  ;;  %v6465_v21 = vld [vmem:[#allocation10 + $0x8] ss:$88 sps:$4 sm:$0xff]  }
 0x1ae   :  { %4477 = vmatpush1.bf16.msra.mxu1 %v6396_v22  ;;  %v6468_v22 = vld [vmem:[#allocation10 + $0x170] ss:$88 sps:$4 sm:$0xff]  }
 0x1af   :  { %4478 = vmatprep.subr.bf16.mxu1 %v6401_v23 }
 0x1b2   :  { %4479 = vmatpush1.bf16.msra.mxu1 %v6399_v24  ;;  %v6473_v24 = vld [vmem:[#allocation10 + $0xbc] ss:$88 sps:$4 sm:$0xff]  }
 0x1b3   :  { %4480 = vmatprep.subr.bf16.mxu1 %v6407_v25  ;;  %v6476_v25 = vld [vmem:[#allocation10 + $0x224] ss:$88 sps:$4 sm:$0xff]  }
 0x1b6   :  { %4481 = vmatpush1.bf16.msra.mxu1 %v6405_v26  ;;  %v6471_v26 = vld [vmem:[#allocation10 + $0xb8] ss:$88 sps:$4 sm:$0xff]  }
 0x1b7   :  { %4482 = vmatprep.subr.bf16.mxu1 %v6413_v27  ;;  %v6474_v27 = vld [vmem:[#allocation10 + $0x220] ss:$88 sps:$4 sm:$0xff]  }
 0x1ba   :  { %4483 = vmatpush1.bf16.msra.mxu1 %v6411_v28  ;;  %v6479_v28 = vld [vmem:[#allocation10 + $0x16c] ss:$88 sps:$4 sm:$0xff]  }
 0x1bb   :  { %4484 = vmatprep.subr.bf16.mxu1 %v6419_v29  ;;  %v6482_v29 = vld [vmem:[#allocation10 + $0x2d4] ss:$88 sps:$4 sm:$0xff]  }
 0x1be   :  { %4485 = vmatpush1.bf16.msra.mxu1 %v6417_v30  ;;  %v6477_v30 = vld [vmem:[#allocation10 + $0x168] ss:$88 sps:$4 sm:$0xff]  }
 0x1bf   :  { %4486 = vmatprep.subr.bf16.mxu1 %v6425_v31  ;;  %v6480_v31 = vld [vmem:[#allocation10 + $0x2d0] ss:$88 sps:$4 sm:$0xff]  }
 0x1c2   :  { %4487 = vmatpush1.bf16.msra.mxu1 %v6423_v32  ;;  %v6485_v32 = vld [vmem:[#allocation10 + $0x21c] ss:$88 sps:$4 sm:$0xff]  }
 0x1c3   :  { %4488 = vmatprep.subr.bf16.mxu1 %v6431_v33  ;;  %v6488_v33 = vld [vmem:[#allocation10 + $0x384] ss:$88 sps:$4 sm:$0xff]  }
 0x1c6   :  { %4489 = vmatpush1.bf16.msra.mxu1 %v6429_v34  ;;  %v6483_v34 = vld [vmem:[#allocation10 + $0x218] ss:$88 sps:$4 sm:$0xff]  }
 0x1c7   :  { %4490 = vmatprep.subr.bf16.mxu1 %v6437_v35  ;;  %v6486_v35 = vld [vmem:[#allocation10 + $0x380] ss:$88 sps:$4 sm:$0xff]  }
 0x1ca   :  { %4491 = vmatpush1.bf16.msra.mxu1 %v6435_v36  ;;  %v6491_v36 = vld [vmem:[#allocation10 + $0x2cc] ss:$88 sps:$4 sm:$0xff]  }
 0x1cb   :  { %4492 = vmatprep.subr.bf16.mxu1 %v6443_v37  ;;  %v6494_v37 = vld [vmem:[#allocation10 + $0x434] ss:$88 sps:$4 sm:$0xff]  }
 0x1ce   :  { %4493 = vmatpush1.bf16.msra.mxu1 %v6441_v39  ;;  %v6492_v39 = vld [vmem:[#allocation10 + $0x430] ss:$88 sps:$4 sm:$0xff]  }
 0x1cf   :  { %4494 = vmatprep.subr.bf16.mxu1 %v6449_v41  ;;  %v6500_v41 = vld [vmem:[#allocation10 + $0x4e4] ss:$88 sps:$4 sm:$0xff]  }
 0x1d2   :  { %4495 = vmatpush1.bf16.msra.mxu1 %v6447_v43  ;;  %v6498_v43 = vld [vmem:[#allocation10 + $0x4e0] ss:$88 sps:$4 sm:$0xff]  }
 0x1d3   :  { %4628 = vmatprep.subr.bf16.mxu1 %v6458_v46  ;;  %v6501_v46 = vld [vmem:[#allocation10 + $0x428] ss:$88 sps:$4 sm:$0xff]  }
 0x260   :  { %v724_v58 = vpop.f32.mrb[4].mxu1 }
 0x261   :  { %v725_v59 = vadd.f32 %v724_v58, %v630_v56  ;;  %v726_v60 = vpop.f32.mrb[5].mxu1  ;;  %v6518_v56 = vld [vmem:[#allocation10 + $0x6f4] ss:$88 sps:$4 sm:$0xff]   ;;  %v6516_v58 = vld [vmem:[#allocation10 + $0x6f0] ss:$88 sps:$4 sm:$0xff]  }
 0x262   :  { %v727_v62 = vadd.f32 %v726_v60, %v634_v57  ;;  %v728_v63 = vpop.f32.mrb[6].mxu1  ;;  %v6513_v57 = vld [vmem:[#allocation10 + $0x588] ss:$88 sps:$4 sm:$0xff]   ;;  %v6524_v60 = vld [vmem:[#allocation10 + $0x7a4] ss:$88 sps:$4 sm:$0xff]  }
 0x263   :  { %v772_v1 = vmax.f32 %v725_v59, 0.0  ;;  %v729_v2 = vpop.f32.mrb[7].mxu1  ;;  %v6521_v59 = vld [vmem:[#allocation10 + $0x63c] ss:$88 sps:$4 sm:$0xff]   ;;  %v6522_v63 = vld [vmem:[#allocation10 + $0x7a0] ss:$88 sps:$4 sm:$0xff]  }
 0x264   :  { %v773_v3 = vmax.f32 %v727_v62, 0.0  ;;  %v6519_v62 = vld [vmem:[#allocation10 + $0x638] ss:$88 sps:$4 sm:$0xff]   ;;  %v6530_v2 = vld [vmem:[#allocation10 + $0x854] ss:$88 sps:$4 sm:$0xff]  }
 0x265   :  { %v7621_v8 = vpack.c.bf16 %v772_v1, %v772_v1  ;;  %v6527_v1 = vld [vmem:[#allocation10 + $0x6ec] ss:$88 sps:$4 sm:$0xff]  }
 0x266   :  { %v7618_v5 = vpack.c.bf16 %v773_v3, %v773_v3  ;;  %v6525_v3 = vld [vmem:[#allocation10 + $0x6e8] ss:$88 sps:$4 sm:$0xff]  }
 0x268   :  { %v765_v10 = vpop.f32.mrb[8].mxu1  ;;  %4496 = vmatprep.mubr.bf16.mxu1 %v7618_v5 }
 0x269   :  { %v766_v11 = vadd.f32 %v765_v10, %v638_v4  ;;  %v767_v12 = vpop.f32.mrb[9].mxu1  ;;  %4497 = vmatmul.mubr.bf16.vlgmr.msra.gmra.mrb[12].mxu1 %v7621_v8  ;;  %v6528_v4 = vld [vmem:[#allocation10 + $0x850] ss:$88 sps:$4 sm:$0xff]   ;;  %v6534_v10 = vld [vmem:[#allocation10 + $0x900] ss:$88 sps:$4 sm:$0xff]  }
 0x26a   :  { %v768_v13 = vadd.f32 %v767_v12, %v642_v7  ;;  %4629 = vmatpush1.bf16.msra.mxu1 %v6456_v6  ;;  %v769_v14 = vpop.f32.mrb[10].mxu1  ;;  %4660 = vmatprep.mubr.bf16.mxu1 %v7618_v5  ;;  %v6533_v6 = vld [vmem:[#allocation10 + $0x79c] ss:$88 sps:$4 sm:$0xff]  }
 0x26b   :  { %v774_v16 = vmax.f32 %v766_v11, 0.0  ;;  %v770_v17 = vpop.f32.mrb[11].mxu1  ;;  %4630 = vmatprep.subr.bf16.mxu1 %v6464_v9  ;;  %v6536_v7 = vld [vmem:[#allocation10 + $0x904] ss:$88 sps:$4 sm:$0xff]   ;;  %v6531_v9 = vld [vmem:[#allocation10 + $0x798] ss:$88 sps:$4 sm:$0xff]  }
 0x26c   :  { %v775_v19 = vmax.f32 %v768_v13, 0.0  ;;  %v6539_v11 = vld [vmem:[#allocation10 + $0x84c] ss:$88 sps:$4 sm:$0xff]   ;;  %v6537_v13 = vld [vmem:[#allocation10 + $0x848] ss:$88 sps:$4 sm:$0xff]  }
 0x26d   :  { %v7628_v23 = vpack.c.bf16 %v774_v16, %v774_v16  ;;  %v6542_v12 = vld [vmem:[#allocation10 + $0x9b4] ss:$88 sps:$4 sm:$0xff]   ;;  %v6540_v14 = vld [vmem:[#allocation10 + $0x9b0] ss:$88 sps:$4 sm:$0xff]   ;;  %v6548_v16 = vld [vmem:[#allocation10 + $0xa64] ss:$88 sps:$4 sm:$0xff]  }
 0x26e   :  { %v7626_v20 = vpack.c.bf16 %v775_v19, %v775_v19  ;;  %4631 = vmatpush1.bf16.msra.mxu1 %v6462_v15  ;;  %v6545_v15 = vld [vmem:[#allocation10 + $0x8fc] ss:$88 sps:$4 sm:$0xff]   ;;  %v6543_v17 = vld [vmem:[#allocation10 + $0x8f8] ss:$88 sps:$4 sm:$0xff]   ;;  %v6551_v19 = vld [vmem:[#allocation10 + $0x9ac] ss:$88 sps:$4 sm:$0xff]  }
 0x26f   :  { %4632 = vmatprep.subr.bf16.mxu1 %v6470_v18  ;;  %v6546_v18 = vld [vmem:[#allocation10 + $0xa60] ss:$88 sps:$4 sm:$0xff]  }
 0x270   :  { %6131 = vmatprep.mubr.msk.bf16.mxu0 %vm4460_vm2, %v7626_v20 }
 0x271   :  { %4538 = vmatmul.mubr.bf16.vlgmr.msra.gmra.mrb[4].mxu0 %v7628_v23 }
 0x272   :  { %4547 = vmatpush1.bf16.msra.mxu0 %v6465_v21  ;;  %4633 = vmatpush1.bf16.msra.mxu1 %v6468_v22  ;;  %v6554_v21 = vld [vmem:[#allocation10 + $0xb14] ss:$88 sps:$4 sm:$0xff]   ;;  %v6549_v22 = vld [vmem:[#allocation10 + $0x9a8] ss:$88 sps:$4 sm:$0xff]  }
 0x273   :  { %4578 = vmatprep.mubr.bf16.mxu0 %v7618_v5  ;;  %4548 = vmatprep.subr.bf16.mxu0 %v6473_v24  ;;  %v6552_v24 = vld [vmem:[#allocation10 + $0xb10] ss:$88 sps:$4 sm:$0xff]  }
 0x274   :  { %4634 = vmatprep.subr.bf16.mxu1 %v6476_v25  ;;  %v6557_v25 = vld [vmem:[#allocation10 + $0xa5c] ss:$88 sps:$4 sm:$0xff]  }
 0x276   :  { %4549 = vmatpush1.bf16.msra.mxu0 %v6471_v26  ;;  %4635 = vmatpush1.bf16.msra.mxu1 %v6474_v27  ;;  %v6560_v26 = vld [vmem:[#allocation10 + $0xbc4] ss:$88 sps:$4 sm:$0xff]   ;;  %v6555_v27 = vld [vmem:[#allocation10 + $0xa58] ss:$88 sps:$4 sm:$0xff]  }
 0x277   :  { %4550 = vmatprep.subr.bf16.mxu0 %v6479_v28  ;;  %4636 = vmatprep.subr.bf16.mxu1 %v6482_v29  ;;  %v6558_v28 = vld [vmem:[#allocation10 + $0xbc0] ss:$88 sps:$4 sm:$0xff]   ;;  %v6563_v29 = vld [vmem:[#allocation10 + $0xb0c] ss:$88 sps:$4 sm:$0xff]  }
 0x27a   :  { %4551 = vmatpush1.bf16.msra.mxu0 %v6477_v30  ;;  %4637 = vmatpush1.bf16.msra.mxu1 %v6480_v31  ;;  %v6566_v30 = vld [vmem:[#allocation10 + $0xc74] ss:$88 sps:$4 sm:$0xff]   ;;  %v6561_v31 = vld [vmem:[#allocation10 + $0xb08] ss:$88 sps:$4 sm:$0xff]  }
 0x27b   :  { %4552 = vmatprep.subr.bf16.mxu0 %v6485_v32  ;;  %4638 = vmatprep.subr.bf16.mxu1 %v6488_v33  ;;  %v6564_v32 = vld [vmem:[#allocation10 + $0xc70] ss:$88 sps:$4 sm:$0xff]   ;;  %v6569_v33 = vld [vmem:[#allocation10 + $0xbbc] ss:$88 sps:$4 sm:$0xff]  }
 0x27e   :  { %4553 = vmatpush1.bf16.msra.mxu0 %v6483_v34  ;;  %4639 = vmatpush1.bf16.msra.mxu1 %v6486_v35  ;;  %v6572_v34 = vld [vmem:[#allocation10 + $0xd24] ss:$88 sps:$4 sm:$0xff]   ;;  %v6567_v35 = vld [vmem:[#allocation10 + $0xbb8] ss:$88 sps:$4 sm:$0xff]  }
 0x27f   :  { %4554 = vmatprep.subr.bf16.mxu0 %v6491_v36  ;;  %4640 = vmatprep.subr.bf16.mxu1 %v6494_v37  ;;  %v6570_v36 = vld [vmem:[#allocation10 + $0xd20] ss:$88 sps:$4 sm:$0xff]   ;;  %v6575_v37 = vld [vmem:[#allocation10 + $0xc6c] ss:$88 sps:$4 sm:$0xff]  }
 0x282   :  { %4555 = vmatpush1.bf16.msra.mxu0 %v6489_v38  ;;  %4641 = vmatpush1.bf16.msra.mxu1 %v6492_v39  ;;  %v6578_v38 = vld [vmem:[#allocation10 + $0xdd4] ss:$88 sps:$4 sm:$0xff]   ;;  %v6573_v39 = vld [vmem:[#allocation10 + $0xc68] ss:$88 sps:$4 sm:$0xff]  }
 0x283   :  { %4556 = vmatprep.subr.bf16.mxu0 %v6497_v40  ;;  %4642 = vmatprep.subr.bf16.mxu1 %v6500_v41  ;;  %v6576_v40 = vld [vmem:[#allocation10 + $0xdd0] ss:$88 sps:$4 sm:$0xff]   ;;  %v6581_v41 = vld [vmem:[#allocation10 + $0xd1c] ss:$88 sps:$4 sm:$0xff]  }
 0x286   :  { %4557 = vmatpush1.bf16.msra.mxu0 %v6495_v42  ;;  %4643 = vmatpush1.bf16.msra.mxu1 %v6498_v43  ;;  %v6584_v42 = vld [vmem:[#allocation10 + $0xe84] ss:$88 sps:$4 sm:$0xff]   ;;  %v6579_v43 = vld [vmem:[#allocation10 + $0xd18] ss:$88 sps:$4 sm:$0xff]  }
 0x287   :  { %4558 = vmatprep.subr.bf16.mxu0 %v6503_v44  ;;  %4644 = vmatprep.subr.bf16.mxu1 %v6506_v45  ;;  %v6582_v44 = vld [vmem:[#allocation10 + $0xe80] ss:$88 sps:$4 sm:$0xff]   ;;  %v6587_v45 = vld [vmem:[#allocation10 + $0xdcc] ss:$88 sps:$4 sm:$0xff]  }
 0x28a   :  { %4559 = vmatpush1.bf16.msra.mxu0 %v6501_v46  ;;  %4645 = vmatpush1.bf16.msra.mxu1 %v6504_v47  ;;  %v6590_v46 = vld [vmem:[#allocation10 + $0xf34] ss:$88 sps:$4 sm:$0xff]   ;;  %v6585_v47 = vld [vmem:[#allocation10 + $0xdc8] ss:$88 sps:$4 sm:$0xff]  }
 0x28b   :  { %4560 = vmatprep.subr.bf16.mxu0 %v6509_v48  ;;  %4646 = vmatprep.subr.bf16.mxu1 %v6512_v49  ;;  %v6588_v48 = vld [vmem:[#allocation10 + $0xf30] ss:$88 sps:$4 sm:$0xff]   ;;  %v6593_v49 = vld [vmem:[#allocation10 + $0xe7c] ss:$88 sps:$4 sm:$0xff]  }
 0x28e   :  { %4561 = vmatpush1.bf16.msra.mxu0 %v6507_v50  ;;  %4647 = vmatpush1.bf16.msra.mxu1 %v6510_v51  ;;  %v6596_v50 = vld [vmem:[#allocation10 + $0xfe4] ss:$88 sps:$4 sm:$0xff]   ;;  %v6591_v51 = vld [vmem:[#allocation10 + $0xe78] ss:$88 sps:$4 sm:$0xff]  }
 0x28f   :  { %4562 = vmatprep.subr.bf16.mxu0 %v6515_v54  ;;  %4648 = vmatprep.subr.bf16.mxu1 %v6518_v56  ;;  %v6594_v54 = vld [vmem:[#allocation10 + $0xfe0] ss:$88 sps:$4 sm:$0xff]   ;;  %v6599_v56 = vld [vmem:[#allocation10 + $0xf2c] ss:$88 sps:$4 sm:$0xff]  }
 0x292   :  { %4563 = vmatpush1.bf16.msra.mxu0 %v6513_v57  ;;  %4649 = vmatpush1.bf16.msra.mxu1 %v6516_v58  ;;  %v6602_v57 = vld [vmem:[#allocation10 + $0x1094] ss:$88 sps:$4 sm:$0xff]   ;;  %v6597_v58 = vld [vmem:[#allocation10 + $0xf28] ss:$88 sps:$4 sm:$0xff]  }
 0x293   :  { %4564 = vmatprep.subr.bf16.mxu0 %v6521_v59  ;;  %4650 = vmatprep.subr.bf16.mxu1 %v6524_v60  ;;  %v6600_v59 = vld [vmem:[#allocation10 + $0x1090] ss:$88 sps:$4 sm:$0xff]   ;;  %v6605_v60 = vld [vmem:[#allocation10 + $0xfdc] ss:$88 sps:$4 sm:$0xff]  }
 0x296   :  { %4565 = vmatpush1.bf16.msra.mxu0 %v6519_v62  ;;  %4651 = vmatpush1.bf16.msra.mxu1 %v6522_v63  ;;  %v6608_v62 = vld [vmem:[#allocation10 + $0x1144] ss:$88 sps:$4 sm:$0xff]   ;;  %v6603_v63 = vld [vmem:[#allocation10 + $0xfd8] ss:$88 sps:$4 sm:$0xff]  }
 0x297   :  { %4566 = vmatprep.subr.bf16.mxu0 %v6527_v1  ;;  %4652 = vmatprep.subr.bf16.mxu1 %v6530_v2  ;;  %v6606_v1 = vld [vmem:[#allocation10 + $0x1140] ss:$88 sps:$4 sm:$0xff]   ;;  %v6611_v2 = vld [vmem:[#allocation10 + $0x108c] ss:$88 sps:$4 sm:$0xff]  }
 0x29a   :  { %4567 = vmatpush1.bf16.msra.mxu0 %v6525_v3  ;;  %4653 = vmatpush1.bf16.msra.mxu1 %v6528_v4  ;;  %v6614_v3 = vld [vmem:[#allocation10 + $0x11f4] ss:$88 sps:$4 sm:$0xff]   ;;  %v6609_v4 = vld [vmem:[#allocation10 + $0x1088] ss:$88 sps:$4 sm:$0xff]  }
 0x29b   :  { %4568 = vmatprep.subr.bf16.mxu0 %v6533_v6  ;;  %4654 = vmatprep.subr.bf16.mxu1 %v6536_v7  ;;  %v6612_v6 = vld [vmem:[#allocation10 + $0x11f0] ss:$88 sps:$4 sm:$0xff]   ;;  %v6617_v7 = vld [vmem:[#allocation10 + $0x113c] ss:$88 sps:$4 sm:$0xff]  }
 0x29e   :  { %4569 = vmatpush1.bf16.msra.mxu0 %v6531_v9  ;;  %4655 = vmatpush1.bf16.msra.mxu1 %v6534_v10  ;;  %v6620_v9 = vld [vmem:[#allocation10 + $0x24] ss:$88 sps:$4 sm:$0xff]   ;;  %v6615_v10 = vld [vmem:[#allocation10 + $0x1138] ss:$88 sps:$4 sm:$0xff]  }
 0x29f   :  { %4570 = vmatprep.subr.bf16.mxu0 %v6539_v11  ;;  %4656 = vmatprep.subr.bf16.mxu1 %v6542_v12  ;;  %v6618_v11 = vld [vmem:[#allocation10 + $0x20] ss:$88 sps:$4 sm:$0xff]   ;;  %v6623_v12 = vld [vmem:[#allocation10 + $0x11ec] ss:$88 sps:$4 sm:$0xff]  }
 0x2a2   :  { %4571 = vmatpush1.bf16.msra.mxu0 %v6537_v13  ;;  %4657 = vmatpush1.bf16.msra.mxu1 %v6540_v14  ;;  %v6626_v13 = vld [vmem:[#allocation10 + $0xd4] ss:$88 sps:$4 sm:$0xff]   ;;  %v6621_v14 = vld [vmem:[#allocation10 + $0x11e8] ss:$88 sps:$4 sm:$0xff]  }
 0x2a3   :  { %4572 = vmatprep.subr.bf16.mxu0 %v6545_v15  ;;  %4658 = vmatprep.subr.bf16.mxu1 %v6548_v16  ;;  %v6624_v15 = vld [vmem:[#allocation10 + $0xd0] ss:$88 sps:$4 sm:$0xff]   ;;  %v6629_v16 = vld [vmem:[#allocation10 + $0x1c] ss:$88 sps:$4 sm:$0xff]  }
 0x2a6   :  { %4573 = vmatpush1.bf16.msra.mxu0 %v6543_v17  ;;  %4659 = vmatpush1.bf16.msra.mxu1 %v6546_v18  ;;  %v6632_v17 = vld [vmem:[#allocation10 + $0x184] ss:$88 sps:$4 sm:$0xff]   ;;  %v6627_v18 = vld [vmem:[#allocation10 + $0x18] ss:$88 sps:$4 sm:$0xff]  }
 0x2a7   :  { %4574 = vmatprep.subr.bf16.mxu0 %v6551_v19  ;;  %4669 = vmatprep.subr.bf16.mxu1 %v6554_v21  ;;  %v6630_v19 = vld [vmem:[#allocation10 + $0x180] ss:$88 sps:$4 sm:$0xff]   ;;  %v6635_v21 = vld [vmem:[#allocation10 + $0xcc] ss:$88 sps:$4 sm:$0xff]  }
 0x2a9   :  { %4661 = vmatmul.mubr.bf16.vlgmr.msra.gmra.mrb[16].mxu1 %v7621_v8 }
 0x2aa   :  { %4575 = vmatpush1.bf16.msra.mxu0 %v6549_v22  ;;  %4670 = vmatpush1.bf16.msra.mxu1 %v6552_v24  ;;  %v6638_v22 = vld [vmem:[#allocation10 + $0x234] ss:$88 sps:$4 sm:$0xff]   ;;  %v6633_v24 = vld [vmem:[#allocation10 + $0xc8] ss:$88 sps:$4 sm:$0xff]  }
 0x2ab   :  { %6133 = vmatprep.mubr.msk.bf16.mxu1 %vm4460_vm2, %v7626_v20  ;;  %4576 = vmatprep.subr.bf16.mxu0 %v6557_v25  ;;  %v6636_v25 = vld [vmem:[#allocation10 + $0x230] ss:$88 sps:$4 sm:$0xff]  }
 0x2ac   :  { %4671 = vmatprep.subr.bf16.mxu1 %v6560_v26  ;;  %v6641_v26 = vld [vmem:[#allocation10 + $0x17c] ss:$88 sps:$4 sm:$0xff]  }
 0x2ae   :  { %4577 = vmatpush1.bf16.msra.mxu0 %v6555_v27  ;;  %4672 = vmatpush1.bf16.msra.mxu1 %v6558_v28  ;;  %v6644_v27 = vld [vmem:[#allocation10 + $0x2e4] ss:$88 sps:$4 sm:$0xff]   ;;  %v6639_v28 = vld [vmem:[#allocation10 + $0x178] ss:$88 sps:$4 sm:$0xff]  }
 0x2af   :  { %4587 = vmatprep.subr.bf16.mxu0 %v6563_v29  ;;  %4673 = vmatprep.subr.bf16.mxu1 %v6566_v30  ;;  %v6642_v29 = vld [vmem:[#allocation10 + $0x2e0] ss:$88 sps:$4 sm:$0xff]   ;;  %v6647_v30 = vld [vmem:[#allocation10 + $0x22c] ss:$88 sps:$4 sm:$0xff]  }
 0x2b1   :  { %4579 = vmatmul.mubr.bf16.vlgmr.msra.gmra.mrb[8].mxu0 %v7621_v8 }
 0x2b2   :  { %4588 = vmatpush1.bf16.msra.mxu0 %v6561_v31  ;;  %6132 = vmatprep.mubr.msk.bf16.mxu0 %vm4460_vm2, %v7626_v20  ;;  %v6650_v31 = vld [vmem:[#allocation10 + $0x394] ss:$88 sps:$4 sm:$0xff]  }
 0x2b3   :  { %4674 = vmatpush1.bf16.msra.mxu1 %v6564_v32  ;;  %4589 = vmatprep.subr.bf16.mxu0 %v6569_v33  ;;  %v6645_v32 = vld [vmem:[#allocation10 + $0x228] ss:$88 sps:$4 sm:$0xff]  }
 0x2b4   :  { %4675 = vmatprep.subr.bf16.mxu1 %v6572_v34  ;;  %v6648_v33 = vld [vmem:[#allocation10 + $0x390] ss:$88 sps:$4 sm:$0xff]   ;;  %v6653_v34 = vld [vmem:[#allocation10 + $0x2dc] ss:$88 sps:$4 sm:$0xff]  }
 0x2b6   :  { %4590 = vmatpush1.bf16.msra.mxu0 %v6567_v35  ;;  %v6656_v35 = vld [vmem:[#allocation10 + $0x444] ss:$88 sps:$4 sm:$0xff]  }
 0x2b7   :  { %4676 = vmatpush1.bf16.msra.mxu1 %v6570_v36  ;;  %4591 = vmatprep.subr.bf16.mxu0 %v6575_v37  ;;  %v6651_v36 = vld [vmem:[#allocation10 + $0x2d8] ss:$88 sps:$4 sm:$0xff]  }
 0x2b8   :  { %4677 = vmatprep.subr.bf16.mxu1 %v6578_v38  ;;  %v6654_v37 = vld [vmem:[#allocation10 + $0x440] ss:$88 sps:$4 sm:$0xff]   ;;  %v6659_v38 = vld [vmem:[#allocation10 + $0x38c] ss:$88 sps:$4 sm:$0xff]  }
 0x2ba   :  { %4592 = vmatpush1.bf16.msra.mxu0 %v6573_v39  ;;  %v6662_v39 = vld [vmem:[#allocation10 + $0x4f4] ss:$88 sps:$4 sm:$0xff]  }
 0x2bb   :  { %4678 = vmatpush1.bf16.msra.mxu1 %v6576_v40  ;;  %4593 = vmatprep.subr.bf16.mxu0 %v6581_v41  ;;  %v6657_v40 = vld [vmem:[#allocation10 + $0x388] ss:$88 sps:$4 sm:$0xff]  }
 0x2bc   :  { %4679 = vmatprep.subr.bf16.mxu1 %v6584_v42  ;;  %v6660_v41 = vld [vmem:[#allocation10 + $0x4f0] ss:$88 sps:$4 sm:$0xff]   ;;  %v6665_v42 = vld [vmem:[#allocation10 + $0x43c] ss:$88 sps:$4 sm:$0xff]  }
 0x2be   :  { %4594 = vmatpush1.bf16.msra.mxu0 %v6579_v43  ;;  %v6668_v43 = vld [vmem:[#allocation10 + $0x5a4] ss:$88 sps:$4 sm:$0xff]  }
 0x2bf   :  { %4680 = vmatpush1.bf16.msra.mxu1 %v6582_v44  ;;  %4595 = vmatprep.subr.bf16.mxu0 %v6587_v45  ;;  %v6663_v44 = vld [vmem:[#allocation10 + $0x438] ss:$88 sps:$4 sm:$0xff]  }
 0x2c0   :  { %4681 = vmatprep.subr.bf16.mxu1 %v6590_v46  ;;  %v6666_v45 = vld [vmem:[#allocation10 + $0x5a0] ss:$88 sps:$4 sm:$0xff]   ;;  %v6671_v46 = vld [vmem:[#allocation10 + $0x4ec] ss:$88 sps:$4 sm:$0xff]  }
 0x2c2   :  { %4596 = vmatpush1.bf16.msra.mxu0 %v6585_v47  ;;  %v6674_v47 = vld [vmem:[#allocation10 + $0x654] ss:$88 sps:$4 sm:$0xff]  }
 0x2c3   :  { %4682 = vmatpush1.bf16.msra.mxu1 %v6588_v48  ;;  %4597 = vmatprep.subr.bf16.mxu0 %v6593_v49  ;;  %v6669_v48 = vld [vmem:[#allocation10 + $0x4e8] ss:$88 sps:$4 sm:$0xff]  }
 0x2c4   :  { %4683 = vmatprep.subr.bf16.mxu1 %v6596_v50  ;;  %v6672_v49 = vld [vmem:[#allocation10 + $0x650] ss:$88 sps:$4 sm:$0xff]   ;;  %v6677_v50 = vld [vmem:[#allocation10 + $0x59c] ss:$88 sps:$4 sm:$0xff]  }
 0x2c6   :  { %4598 = vmatpush1.bf16.msra.mxu0 %v6591_v51  ;;  %v6680_v51 = vld [vmem:[#allocation10 + $0x704] ss:$88 sps:$4 sm:$0xff]  }
 0x2c7   :  { %4684 = vmatpush1.bf16.msra.mxu1 %v6594_v54  ;;  %4599 = vmatprep.subr.bf16.mxu0 %v6599_v56  ;;  %v6675_v54 = vld [vmem:[#allocation10 + $0x598] ss:$88 sps:$4 sm:$0xff]  }
 0x2c8   :  { %4685 = vmatprep.subr.bf16.mxu1 %v6602_v57  ;;  %v6678_v56 = vld [vmem:[#allocation10 + $0x700] ss:$88 sps:$4 sm:$0xff]   ;;  %v6683_v57 = vld [vmem:[#allocation10 + $0x64c] ss:$88 sps:$4 sm:$0xff]  }
 0x2ca   :  { %4600 = vmatpush1.bf16.msra.mxu0 %v6597_v58  ;;  %v6686_v58 = vld [vmem:[#allocation10 + $0x7b4] ss:$88 sps:$4 sm:$0xff]  }
 0x2cb   :  { %4686 = vmatpush1.bf16.msra.mxu1 %v6600_v59  ;;  %4601 = vmatprep.subr.bf16.mxu0 %v6605_v60  ;;  %v6681_v59 = vld [vmem:[#allocation10 + $0x648] ss:$88 sps:$4 sm:$0xff]  }
 0x2cc   :  { %4687 = vmatprep.subr.bf16.mxu1 %v6608_v62  ;;  %v6684_v60 = vld [vmem:[#allocation10 + $0x7b0] ss:$88 sps:$4 sm:$0xff]   ;;  %v6689_v62 = vld [vmem:[#allocation10 + $0x6fc] ss:$88 sps:$4 sm:$0xff]  }
 0x2ce   :  { %4602 = vmatpush1.bf16.msra.mxu0 %v6603_v63  ;;  %v6692_v63 = vld [vmem:[#allocation10 + $0x864] ss:$88 sps:$4 sm:$0xff]  }
 0x2cf   :  { %4688 = vmatpush1.bf16.msra.mxu1 %v6606_v1  ;;  %4603 = vmatprep.subr.bf16.mxu0 %v6611_v2  ;;  %v6687_v1 = vld [vmem:[#allocation10 + $0x6f8] ss:$88 sps:$4 sm:$0xff]  }
 0x2d0   :  { %4689 = vmatprep.subr.bf16.mxu1 %v6614_v3  ;;  %v6690_v2 = vld [vmem:[#allocation10 + $0x860] ss:$88 sps:$4 sm:$0xff]   ;;  %v6695_v3 = vld [vmem:[#allocation10 + $0x7ac] ss:$88 sps:$4 sm:$0xff]  }
 0x2d2   :  { %4604 = vmatpush1.bf16.msra.mxu0 %v6609_v4  ;;  %v6698_v4 = vld [vmem:[#allocation10 + $0x914] ss:$88 sps:$4 sm:$0xff]  }
 0x2d3   :  { %4690 = vmatpush1.bf16.msra.mxu1 %v6612_v6  ;;  %4605 = vmatprep.subr.bf16.mxu0 %v6617_v7  ;;  %v6693_v6 = vld [vmem:[#allocation10 + $0x7a8] ss:$88 sps:$4 sm:$0xff]  }
 0x2d4   :  { %4792 = vmatprep.subr.bf16.mxu1 %v6620_v9  ;;  %v6696_v7 = vld [vmem:[#allocation10 + $0x910] ss:$88 sps:$4 sm:$0xff]   ;;  %v6701_v9 = vld [vmem:[#allocation10 + $0x85c] ss:$88 sps:$4 sm:$0xff]  }
 0x2d6   :  { %4702 = vmatmul.mubr.bf16.vlgmr.msra.gmra.mrb[16].mxu1 %v7628_v23  ;;  %4606 = vmatpush1.bf16.msra.mxu0 %v6615_v10  ;;  %v6704_v10 = vld [vmem:[#allocation10 + $0x9c4] ss:$88 sps:$4 sm:$0xff]  }
 0x2d7   :  { %4793 = vmatpush1.bf16.msra.mxu1 %v6618_v11  ;;  %4824 = vmatprep.mubr.bf16.mxu1 %v7618_v5  ;;  %v6699_v11 = vld [vmem:[#allocation10 + $0x858] ss:$88 sps:$4 sm:$0xff]  }
 0x2d8   :  { %4607 = vmatprep.subr.bf16.mxu0 %v6623_v12  ;;  %4794 = vmatprep.subr.bf16.mxu1 %v6626_v13  ;;  %v6702_v12 = vld [vmem:[#allocation10 + $0x9c0] ss:$88 sps:$4 sm:$0xff]   ;;  %v6707_v13 = vld [vmem:[#allocation10 + $0x90c] ss:$88 sps:$4 sm:$0xff]  }
 0x2da   :  { %4608 = vmatpush1.bf16.msra.mxu0 %v6621_v14  ;;  %v6710_v14 = vld [vmem:[#allocation10 + $0xa74] ss:$88 sps:$4 sm:$0xff]  }
 0x2db   :  { %4795 = vmatpush1.bf16.msra.mxu1 %v6624_v15  ;;  %4710 = vmatprep.subr.bf16.mxu0 %v6629_v16  ;;  %v6705_v15 = vld [vmem:[#allocation10 + $0x908] ss:$88 sps:$4 sm:$0xff]  }
 0x2dc   :  { %4796 = vmatprep.subr.bf16.mxu1 %v6632_v17  ;;  %v6708_v16 = vld [vmem:[#allocation10 + $0xa70] ss:$88 sps:$4 sm:$0xff]   ;;  %v6713_v17 = vld [vmem:[#allocation10 + $0x9bc] ss:$88 sps:$4 sm:$0xff]  }
 0x2dd   :  { %4620 = vmatmul.mubr.bf16.vlgmr.msra.gmra.mrb[8].mxu0 %v7628_v23 }
 0x2de   :  { %4711 = vmatpush1.bf16.msra.mxu0 %v6627_v18  ;;  %4742 = vmatprep.mubr.bf16.mxu0 %v7618_v5  ;;  %v6716_v18 = vld [vmem:[#allocation10 + $0xb24] ss:$88 sps:$4 sm:$0xff]  }
 0x2df   :  { %4797 = vmatpush1.bf16.msra.mxu1 %v6630_v19  ;;  %4712 = vmatprep.subr.bf16.mxu0 %v6635_v21  ;;  %v6711_v19 = vld [vmem:[#allocation10 + $0x9b8] ss:$88 sps:$4 sm:$0xff]  }
 0x2e0   :  { %4798 = vmatprep.subr.bf16.mxu1 %v6638_v22  ;;  %v6714_v21 = vld [vmem:[#allocation10 + $0xb20] ss:$88 sps:$4 sm:$0xff]   ;;  %v6719_v22 = vld [vmem:[#allocation10 + $0xa6c] ss:$88 sps:$4 sm:$0xff]  }
 0x2e2   :  { %4713 = vmatpush1.bf16.msra.mxu0 %v6633_v24  ;;  %v6722_v24 = vld [vmem:[#allocation10 + $0xbd4] ss:$88 sps:$4 sm:$0xff]  }
 0x2e3   :  { %4799 = vmatpush1.bf16.msra.mxu1 %v6636_v25  ;;  %4714 = vmatprep.subr.bf16.mxu0 %v6641_v26  ;;  %v6717_v25 = vld [vmem:[#allocation10 + $0xa68] ss:$88 sps:$4 sm:$0xff]  }
 0x2e4   :  { %4800 = vmatprep.subr.bf16.mxu1 %v6644_v27  ;;  %v6720_v26 = vld [vmem:[#allocation10 + $0xbd0] ss:$88 sps:$4 sm:$0xff]   ;;  %v6725_v27 = vld [vmem:[#allocation10 + $0xb1c] ss:$88 sps:$4 sm:$0xff]  }
 0x2e6   :  { %4715 = vmatpush1.bf16.msra.mxu0 %v6639_v28  ;;  %v6728_v28 = vld [vmem:[#allocation10 + $0xc84] ss:$88 sps:$4 sm:$0xff]  }
 0x2e7   :  { %4801 = vmatpush1.bf16.msra.mxu1 %v6642_v29  ;;  %4716 = vmatprep.subr.bf16.mxu0 %v6647_v30  ;;  %v6723_v29 = vld [vmem:[#allocation10 + $0xb18] ss:$88 sps:$4 sm:$0xff]  }
 0x2e8   :  { %4802 = vmatprep.subr.bf16.mxu1 %v6650_v31  ;;  %v6726_v30 = vld [vmem:[#allocation10 + $0xc80] ss:$88 sps:$4 sm:$0xff]   ;;  %v6731_v31 = vld [vmem:[#allocation10 + $0xbcc] ss:$88 sps:$4 sm:$0xff]  }
 0x2ea   :  { %4717 = vmatpush1.bf16.msra.mxu0 %v6645_v32  ;;  %v6734_v32 = vld [vmem:[#allocation10 + $0xd34] ss:$88 sps:$4 sm:$0xff]  }
 0x2eb   :  { %4803 = vmatpush1.bf16.msra.mxu1 %v6648_v33  ;;  %4718 = vmatprep.subr.bf16.mxu0 %v6653_v34  ;;  %v6729_v33 = vld [vmem:[#allocation10 + $0xbc8] ss:$88 sps:$4 sm:$0xff]  }
 0x2ec   :  { %4804 = vmatprep.subr.bf16.mxu1 %v6656_v35  ;;  %v6732_v34 = vld [vmem:[#allocation10 + $0xd30] ss:$88 sps:$4 sm:$0xff]   ;;  %v6737_v35 = vld [vmem:[#allocation10 + $0xc7c] ss:$88 sps:$4 sm:$0xff]  }
 0x2ee   :  { %4719 = vmatpush1.bf16.msra.mxu0 %v6651_v36  ;;  %v6740_v36 = vld [vmem:[#allocation10 + $0xde4] ss:$88 sps:$4 sm:$0xff]  }
 0x2ef   :  { %4805 = vmatpush1.bf16.msra.mxu1 %v6654_v37  ;;  %4720 = vmatprep.subr.bf16.mxu0 %v6659_v38  ;;  %v6735_v37 = vld [vmem:[#allocation10 + $0xc78] ss:$88 sps:$4 sm:$0xff]  }
 0x2f0   :  { %4806 = vmatprep.subr.bf16.mxu1 %v6662_v39  ;;  %v6738_v38 = vld [vmem:[#allocation10 + $0xde0] ss:$88 sps:$4 sm:$0xff]   ;;  %v6743_v39 = vld [vmem:[#allocation10 + $0xd2c] ss:$88 sps:$4 sm:$0xff]  }
 0x2f2   :  { %4721 = vmatpush1.bf16.msra.mxu0 %v6657_v40  ;;  %v6746_v40 = vld [vmem:[#allocation10 + $0xe94] ss:$88 sps:$4 sm:$0xff]  }
 0x2f3   :  { %4807 = vmatpush1.bf16.msra.mxu1 %v6660_v41  ;;  %4722 = vmatprep.subr.bf16.mxu0 %v6665_v42  ;;  %v6741_v41 = vld [vmem:[#allocation10 + $0xd28] ss:$88 sps:$4 sm:$0xff]  }
 0x2f4   :  { %4808 = vmatprep.subr.bf16.mxu1 %v6668_v43  ;;  %v6744_v42 = vld [vmem:[#allocation10 + $0xe90] ss:$88 sps:$4 sm:$0xff]   ;;  %v6749_v43 = vld [vmem:[#allocation10 + $0xddc] ss:$88 sps:$4 sm:$0xff]  }
 0x2f6   :  { %4723 = vmatpush1.bf16.msra.mxu0 %v6663_v44  ;;  %v6752_v44 = vld [vmem:[#allocation10 + $0xf44] ss:$88 sps:$4 sm:$0xff]  }
 0x2f7   :  { %4809 = vmatpush1.bf16.msra.mxu1 %v6666_v45  ;;  %4724 = vmatprep.subr.bf16.mxu0 %v6671_v46  ;;  %v6747_v45 = vld [vmem:[#allocation10 + $0xdd8] ss:$88 sps:$4 sm:$0xff]  }
 0x2f8   :  { %4810 = vmatprep.subr.bf16.mxu1 %v6674_v47  ;;  %v6750_v46 = vld [vmem:[#allocation10 + $0xf40] ss:$88 sps:$4 sm:$0xff]   ;;  %v6755_v47 = vld [vmem:[#allocation10 + $0xe8c] ss:$88 sps:$4 sm:$0xff]  }
 0x2fa   :  { %4725 = vmatpush1.bf16.msra.mxu0 %v6669_v48  ;;  %v6758_v48 = vld [vmem:[#allocation10 + $0xff4] ss:$88 sps:$4 sm:$0xff]  }
 0x2fb   :  { %4811 = vmatpush1.bf16.msra.mxu1 %v6672_v49  ;;  %4726 = vmatprep.subr.bf16.mxu0 %v6677_v50  ;;  %v6753_v49 = vld [vmem:[#allocation10 + $0xe88] ss:$88 sps:$4 sm:$0xff]  }
 0x2fc   :  { %4812 = vmatprep.subr.bf16.mxu1 %v6680_v51  ;;  %v6756_v50 = vld [vmem:[#allocation10 + $0xff0] ss:$88 sps:$4 sm:$0xff]   ;;  %v6761_v51 = vld [vmem:[#allocation10 + $0xf3c] ss:$88 sps:$4 sm:$0xff]  }
 0x2fe   :  { %4727 = vmatpush1.bf16.msra.mxu0 %v6675_v54  ;;  %v6764_v54 = vld [vmem:[#allocation10 + $0x10a4] ss:$88 sps:$4 sm:$0xff]  }
 0x2ff   :  { %4813 = vmatpush1.bf16.msra.mxu1 %v6678_v56  ;;  %4728 = vmatprep.subr.bf16.mxu0 %v6683_v57  ;;  %v6759_v56 = vld [vmem:[#allocation10 + $0xf38] ss:$88 sps:$4 sm:$0xff]  }
 0x300   :  { %4814 = vmatprep.subr.bf16.mxu1 %v6686_v58  ;;  %v6762_v57 = vld [vmem:[#allocation10 + $0x10a0] ss:$88 sps:$4 sm:$0xff]   ;;  %v6767_v58 = vld [vmem:[#allocation10 + $0xfec] ss:$88 sps:$4 sm:$0xff]  }
 0x302   :  { %4729 = vmatpush1.bf16.msra.mxu0 %v6681_v59  ;;  %v6770_v59 = vld [vmem:[#allocation10 + $0x1154] ss:$88 sps:$4 sm:$0xff]  }
 0x303   :  { %4815 = vmatpush1.bf16.msra.mxu1 %v6684_v60  ;;  %4730 = vmatprep.subr.bf16.mxu0 %v6689_v62  ;;  %v6765_v60 = vld [vmem:[#allocation10 + $0xfe8] ss:$88 sps:$4 sm:$0xff]  }
 0x304   :  { %4816 = vmatprep.subr.bf16.mxu1 %v6692_v63  ;;  %v6768_v62 = vld [vmem:[#allocation10 + $0x1150] ss:$88 sps:$4 sm:$0xff]   ;;  %v6773_v63 = vld [vmem:[#allocation10 + $0x109c] ss:$88 sps:$4 sm:$0xff]  }
 0x306   :  { %4731 = vmatpush1.bf16.msra.mxu0 %v6687_v1  ;;  %v6776_v1 = vld [vmem:[#allocation10 + $0x1204] ss:$88 sps:$4 sm:$0xff]  }
 0x307   :  { %4817 = vmatpush1.bf16.msra.mxu1 %v6690_v2  ;;  %4732 = vmatprep.subr.bf16.mxu0 %v6695_v3  ;;  %v6771_v2 = vld [vmem:[#allocation10 + $0x1098] ss:$88 sps:$4 sm:$0xff]  }
 0x308   :  { %4818 = vmatprep.subr.bf16.mxu1 %v6698_v4  ;;  %v6774_v3 = vld [vmem:[#allocation10 + $0x1200] ss:$88 sps:$4 sm:$0xff]   ;;  %v6779_v4 = vld [vmem:[#allocation10 + $0x114c] ss:$88 sps:$4 sm:$0xff]  }
 0x30a   :  { %4733 = vmatpush1.bf16.msra.mxu0 %v6693_v6  ;;  %v7650_v6 = vld [vmem:[#allocation12] sm:$0xff] }
 0x30b   :  { %4819 = vmatpush1.bf16.msra.mxu1 %v6696_v7  ;;  %4734 = vmatprep.subr.bf16.mxu0 %v6701_v9  ;;  %v6782_v9 = vld [vmem:[#allocation10 + $0x34] ss:$88 sps:$4 sm:$0xff]  }
 0x30c   :  { %4820 = vmatprep.subr.bf16.mxu1 %v6704_v10 }
 0x30e   :  { %4735 = vmatpush1.bf16.msra.mxu0 %v6699_v11 }
 0x30f   :  { %4821 = vmatpush1.bf16.msra.mxu1 %v6702_v12  ;;  %4736 = vmatprep.subr.bf16.mxu0 %v6707_v13  ;;  %v6777_v12 = vld [vmem:[#allocation10 + $0x1148] ss:$88 sps:$4 sm:$0xff]   ;;  %v1383_v13 = vrot.slane %v7650_v6, %v7604_v53 }
 0x310   :  { %4822 = vmatprep.subr.bf16.mxu1 %v6710_v14 }
 0x312   :  { %4737 = vmatpush1.bf16.msra.mxu0 %v6705_v15  ;;  %v6780_v15 = vld [vmem:[#allocation10 + $0x30] ss:$88 sps:$4 sm:$0xff]  }
 0x313   :  { %4823 = vmatpush1.bf16.msra.mxu1 %v6708_v16  ;;  %4738 = vmatprep.subr.bf16.mxu0 %v6713_v17  ;;  %v1387_v16 = vrot.slane %v7650_v6, %v7607_v55  ;;  %v6785_v17 = vld [vmem:[#allocation10 + $0x11fc] ss:$88 sps:$4 sm:$0xff]  }
 0x314   :  { %4833 = vmatprep.subr.bf16.mxu1 %v6716_v18  ;;  %v6788_v18 = vld [vmem:[#allocation10 + $0xe4] ss:$88 sps:$4 sm:$0xff]  }
 0x316   :  { %4825 = vmatmul.mubr.bf16.vlgmr.msra.gmra.mrb[20].mxu1 %v7621_v8  ;;  %4739 = vmatpush1.bf16.msra.mxu0 %v6711_v19  ;;  %v6783_v19 = vld [vmem:[#allocation10 + $0x11f8] ss:$88 sps:$4 sm:$0xff]  }
 0x317   :  { %4834 = vmatpush1.bf16.msra.mxu1 %v6714_v21  ;;  %6135 = vmatprep.mubr.msk.bf16.mxu1 %vm4460_vm2, %v7626_v20 }
 0x318   :  { %4740 = vmatprep.subr.bf16.mxu0 %v6719_v22  ;;  %4835 = vmatprep.subr.bf16.mxu1 %v6722_v24  ;;  %v6786_v22 = vld [vmem:[#allocation10 + $0xe0] ss:$88 sps:$4 sm:$0xff]   ;;  %v6791_v24 = vld [vmem:[#allocation10 + $0x2c] ss:$88 sps:$4 sm:$0xff]  }
 0x31a   :  { %4741 = vmatpush1.bf16.msra.mxu0 %v6717_v25 }
 0x31b   :  { %4836 = vmatpush1.bf16.msra.mxu1 %v6720_v26  ;;  %4751 = vmatprep.subr.bf16.mxu0 %v6725_v27  ;;  %v6794_v27 = vld [vmem:[#allocation10 + $0x194] ss:$88 sps:$4 sm:$0xff]  }
 0x31c   :  { %4837 = vmatprep.subr.bf16.mxu1 %v6728_v28 }
 0x31d   :  { %4743 = vmatmul.mubr.bf16.vlgmr.msra.gmra.mrb[12].mxu0 %v7621_v8 }
 0x31e   :  { %4752 = vmatpush1.bf16.msra.mxu0 %v6723_v29  ;;  %6134 = vmatprep.mubr.msk.bf16.mxu0 %vm4460_vm2, %v7626_v20 }
 0x31f   :  { %4838 = vmatpush1.bf16.msra.mxu1 %v6726_v30  ;;  %4753 = vmatprep.subr.bf16.mxu0 %v6731_v31 }
 0x320   :  { %4839 = vmatprep.subr.bf16.mxu1 %v6734_v32  ;;  %v6789_v32 = vld [vmem:[#allocation10 + $0x28] ss:$88 sps:$4 sm:$0xff]  }
 0x322   :  { %4754 = vmatpush1.bf16.msra.mxu0 %v6729_v33 }
 0x323   :  { %4840 = vmatpush1.bf16.msra.mxu1 %v6732_v34  ;;  %4755 = vmatprep.subr.bf16.mxu0 %v6737_v35  ;;  %v6792_v35 = vld [vmem:[#allocation10 + $0x190] ss:$88 sps:$4 sm:$0xff]  }
 0x324   :  { %4841 = vmatprep.subr.bf16.mxu1 %v6740_v36  ;;  %v6797_v36 = vld [vmem:[#allocation10 + $0xdc] ss:$88 sps:$4 sm:$0xff]  }
 0x326   :  { %4756 = vmatpush1.bf16.msra.mxu0 %v6735_v37 }
 0x327   :  { %4842 = vmatpush1.bf16.msra.mxu1 %v6738_v38  ;;  %4757 = vmatprep.subr.bf16.mxu0 %v6743_v39  ;;  %v6800_v38 = vld [vmem:[#allocation10 + $0x244] ss:$88 sps:$4 sm:$0xff]  }
 0x328   :  { %4843 = vmatprep.subr.bf16.mxu1 %v6746_v40  ;;  %v6795_v40 = vld [vmem:[#allocation10 + $0xd8] ss:$88 sps:$4 sm:$0xff]  }
 0x32a   :  { %4758 = vmatpush1.bf16.msra.mxu0 %v6741_v41  ;;  %v6798_v41 = vld [vmem:[#allocation10 + $0x240] ss:$88 sps:$4 sm:$0xff]  }
 0x32b   :  { %4844 = vmatpush1.bf16.msra.mxu1 %v6744_v42  ;;  %4759 = vmatprep.subr.bf16.mxu0 %v6749_v43  ;;  %v6803_v42 = vld [vmem:[#allocation10 + $0x18c] ss:$88 sps:$4 sm:$0xff]  }
 0x32c   :  { %4845 = vmatprep.subr.bf16.mxu1 %v6752_v44  ;;  %v6806_v43 = vld [vmem:[#allocation10 + $0x2f4] ss:$88 sps:$4 sm:$0xff]   ;;  %v6801_v44 = vld [vmem:[#allocation10 + $0x188] ss:$88 sps:$4 sm:$0xff]  }
 0x32e   :  { %4760 = vmatpush1.bf16.msra.mxu0 %v6747_v45  ;;  %v6804_v45 = vld [vmem:[#allocation10 + $0x2f0] ss:$88 sps:$4 sm:$0xff]  }
 0x32f   :  { %4846 = vmatpush1.bf16.msra.mxu1 %v6750_v46  ;;  %4761 = vmatprep.subr.bf16.mxu0 %v6755_v47  ;;  %v6809_v46 = vld [vmem:[#allocation10 + $0x23c] ss:$88 sps:$4 sm:$0xff]  }
 0x330   :  { %4847 = vmatprep.subr.bf16.mxu1 %v6758_v48  ;;  %v6812_v47 = vld [vmem:[#allocation10 + $0x3a4] ss:$88 sps:$4 sm:$0xff]   ;;  %v6807_v48 = vld [vmem:[#allocation10 + $0x238] ss:$88 sps:$4 sm:$0xff]  }
 0x332   :  { %4762 = vmatpush1.bf16.msra.mxu0 %v6753_v49  ;;  %v6810_v49 = vld [vmem:[#allocation10 + $0x3a0] ss:$88 sps:$4 sm:$0xff]  }
 0x333   :  { %4848 = vmatpush1.bf16.msra.mxu1 %v6756_v50  ;;  %4763 = vmatprep.subr.bf16.mxu0 %v6761_v51  ;;  %v6815_v50 = vld [vmem:[#allocation10 + $0x2ec] ss:$88 sps:$4 sm:$0xff]  }
 0x334   :  { %4849 = vmatprep.subr.bf16.mxu1 %v6764_v54  ;;  %v6818_v51 = vld [vmem:[#allocation10 + $0x454] ss:$88 sps:$4 sm:$0xff]   ;;  %v6813_v54 = vld [vmem:[#allocation10 + $0x2e8] ss:$88 sps:$4 sm:$0xff]  }
 0x336   :  { %4764 = vmatpush1.bf16.msra.mxu0 %v6759_v56  ;;  %v6816_v56 = vld [vmem:[#allocation10 + $0x450] ss:$88 sps:$4 sm:$0xff]  }
 0x337   :  { %4850 = vmatpush1.bf16.msra.mxu1 %v6762_v57  ;;  %4765 = vmatprep.subr.bf16.mxu0 %v6767_v58  ;;  %v6821_v57 = vld [vmem:[#allocation10 + $0x39c] ss:$88 sps:$4 sm:$0xff]  }
 0x338   :  { %4851 = vmatprep.subr.bf16.mxu1 %v6770_v59  ;;  %v6824_v58 = vld [vmem:[#allocation10 + $0x504] ss:$88 sps:$4 sm:$0xff]   ;;  %v6819_v59 = vld [vmem:[#allocation10 + $0x398] ss:$88 sps:$4 sm:$0xff]  }
 0x33a   :  { %4766 = vmatpush1.bf16.msra.mxu0 %v6765_v60  ;;  %v6822_v60 = vld [vmem:[#allocation10 + $0x500] ss:$88 sps:$4 sm:$0xff]  }
 0x33b   :  { %4852 = vmatpush1.bf16.msra.mxu1 %v6768_v62  ;;  %4767 = vmatprep.subr.bf16.mxu0 %v6773_v63  ;;  %v6827_v62 = vld [vmem:[#allocation10 + $0x44c] ss:$88 sps:$4 sm:$0xff]  }
 0x33c   :  { %v4498_v7 = vpop.f32.mrb[12].mxu1  ;;  %4853 = vmatprep.subr.bf16.mxu1 %v6776_v1  ;;  %v6830_v63 = vld [vmem:[#allocation10 + $0x5b4] ss:$88 sps:$4 sm:$0xff]   ;;  %v6825_v1 = vld [vmem:[#allocation10 + $0x448] ss:$88 sps:$4 sm:$0xff]  }
 0x33d   :  { %v4500_v10 = vpop.f32.mrb[13].mxu1  ;;  %v4499_v21 = vadd.f32 %v4498_v7, %v1383_v13  ;;  %v6831_v7 = vld [vmem:[#allocation10 + $0x4f8] ss:$88 sps:$4 sm:$0xff]  }
 0x33e   :  { %4768 = vmatpush1.bf16.msra.mxu0 %v6771_v2  ;;  %v4502_v11 = vpop.f32.mrb[14].mxu1  ;;  %v4501_v25 = vadd.f32 %v4500_v10, %v1387_v16  ;;  %v6828_v2 = vld [vmem:[#allocation10 + $0x5b0] ss:$88 sps:$4 sm:$0xff]   ;;  %v6839_v10 = vld [vmem:[#allocation10 + $0x5ac] ss:$88 sps:$4 sm:$0xff]  }
 0x33f   :  { %4854 = vmatpush1.bf16.msra.mxu1 %v6774_v3  ;;  %v4503_v14 = vpop.f32.mrb[15].mxu1  ;;  %4769 = vmatprep.subr.bf16.mxu0 %v6779_v4  ;;  %v6833_v3 = vld [vmem:[#allocation10 + $0x4fc] ss:$88 sps:$4 sm:$0xff]   ;;  %v6840_v13 = vld [vmem:[#allocation10 + $0x710] ss:$88 sps:$4 sm:$0xff]  }
 0x340   :  { %4956 = vmatprep.subr.bf16.mxu1 %v6782_v9  ;;  %v6836_v4 = vld [vmem:[#allocation10 + $0x664] ss:$88 sps:$4 sm:$0xff]   ;;  %v6834_v9 = vld [vmem:[#allocation10 + $0x660] ss:$88 sps:$4 sm:$0xff]   ;;  %v6842_v11 = vld [vmem:[#allocation10 + $0x714] ss:$88 sps:$4 sm:$0xff]  }
 0x341   :  { %v6845_v14 = vld [vmem:[#allocation10 + $0x65c] ss:$88 sps:$4 sm:$0xff]   ;;  %v6843_v16 = vld [vmem:[#allocation10 + $0x658] ss:$88 sps:$4 sm:$0xff]  }
 0x342   :  { %4866 = vmatmul.mubr.bf16.vlgmr.msra.gmra.mrb[20].mxu1 %v7628_v23  ;;  %4770 = vmatpush1.bf16.msra.mxu0 %v6777_v12  ;;  %v6837_v12 = vld [vmem:[#allocation10 + $0x5a8] ss:$88 sps:$4 sm:$0xff]  }
 0x343   :  { %4957 = vmatpush1.bf16.msra.mxu1 %v6780_v15  ;;  %4988 = vmatprep.mubr.bf16.mxu1 %v7618_v5  ;;  %v6848_v15 = vld [vmem:[#allocation10 + $0x7c4] ss:$88 sps:$4 sm:$0xff]  }
 0x344   :  { %v4539_v26 = vpop.f32.mrb[4].mxu0  ;;  %4771 = vmatprep.subr.bf16.mxu0 %v6785_v17  ;;  %4958 = vmatprep.subr.bf16.mxu1 %v6788_v18  ;;  %v6846_v17 = vld [vmem:[#allocation10 + $0x7c0] ss:$88 sps:$4 sm:$0xff]   ;;  %v6851_v18 = vld [vmem:[#allocation10 + $0x70c] ss:$88 sps:$4 sm:$0xff]  }
 0x345   :  { %v4540_v28 = vadd.f32 %v4539_v26, %v4499_v21  ;;  %v4541_v29 = vpop.f32.mrb[5].mxu0  ;;  %v6849_v21 = vld [vmem:[#allocation10 + $0x708] ss:$88 sps:$4 sm:$0xff]   ;;  %v6855_v26 = vld [vmem:[#allocation10 + $0x7b8] ss:$88 sps:$4 sm:$0xff]  }
 0x346   :  { %v4542_v30 = vadd.f32 %v4541_v29, %v4501_v25  ;;  %4772 = vmatpush1.bf16.msra.mxu0 %v6783_v19  ;;  %v4543_v31 = vpop.f32.mrb[6].mxu0  ;;  %v6854_v19 = vld [vmem:[#allocation10 + $0x874] ss:$88 sps:$4 sm:$0xff]   ;;  %v6860_v25 = vld [vmem:[#allocation10 + $0x924] ss:$88 sps:$4 sm:$0xff]  }
 0x347   :  { %v5366_v33 = vmax.f32 %v4540_v28, 0.0  ;;  %4959 = vmatpush1.bf16.msra.mxu1 %v6786_v22  ;;  %v4544_v34 = vpop.f32.mrb[7].mxu0  ;;  %4874 = vmatprep.subr.bf16.mxu0 %v6791_v24  ;;  %v6852_v22 = vld [vmem:[#allocation10 + $0x870] ss:$88 sps:$4 sm:$0xff]   ;;  %v6857_v24 = vld [vmem:[#allocation10 + $0x7bc] ss:$88 sps:$4 sm:$0xff]  }
 0x348   :  { %v5367_v37 = vmax.f32 %v4542_v30, 0.0  ;;  %4960 = vmatprep.subr.bf16.mxu1 %v6794_v27  ;;  %v6858_v27 = vld [vmem:[#allocation10 + $0x920] ss:$88 sps:$4 sm:$0xff]   ;;  %v6863_v28 = vld [vmem:[#allocation10 + $0x86c] ss:$88 sps:$4 sm:$0xff]  }
 0x349   :  { %4784 = vmatmul.mubr.bf16.vlgmr.msra.gmra.mrb[12].mxu0 %v7628_v23  ;;  %v6866_v29 = vld [vmem:[#allocation10 + $0x9d4] ss:$88 sps:$4 sm:$0xff]   ;;  %v6861_v30 = vld [vmem:[#allocation10 + $0x868] ss:$88 sps:$4 sm:$0xff]   ;;  %v6867_v34 = vld [vmem:[#allocation10 + $0x918] ss:$88 sps:$4 sm:$0xff]  }
 0x34a   :  { %v7659_v39 = vcombine.low %v5366_v33, %v5367_v37  ;;  %4875 = vmatpush1.bf16.msra.mxu0 %v6789_v32  ;;  %4906 = vmatprep.mubr.bf16.mxu0 %v7618_v5  ;;  %v6864_v31 = vld [vmem:[#allocation10 + $0x9d0] ss:$88 sps:$4 sm:$0xff]   ;;  %v6869_v32 = vld [vmem:[#allocation10 + $0x91c] ss:$88 sps:$4 sm:$0xff]  }
 0x34b   :  { %4961 = vmatpush1.bf16.msra.mxu1 %v6792_v35  ;;  %4876 = vmatprep.subr.bf16.mxu0 %v6797_v36  ;;  %v6872_v33 = vld [vmem:[#allocation10 + $0xa84] ss:$88 sps:$4 sm:$0xff]   ;;  %v6870_v35 = vld [vmem:[#allocation10 + $0xa80] ss:$88 sps:$4 sm:$0xff]   ;;  %v6878_v37 = vld [vmem:[#allocation10 + $0xb34] ss:$88 sps:$4 sm:$0xff]  }
 0x34c   :  { %4962 = vmatprep.subr.bf16.mxu1 %v6800_v38  ;;  %v6875_v36 = vld [vmem:[#allocation10 + $0x9cc] ss:$88 sps:$4 sm:$0xff]   ;;  %v6873_v38 = vld [vmem:[#allocation10 + $0x9c8] ss:$88 sps:$4 sm:$0xff]  }
 0x34e   :  { %4877 = vmatpush1.bf16.msra.mxu0 %v6795_v40  ;;  %v6876_v40 = vld [vmem:[#allocation10 + $0xb30] ss:$88 sps:$4 sm:$0xff]  }
 0x34f   :  { %4963 = vmatpush1.bf16.msra.mxu1 %v6798_v41  ;;  %4878 = vmatprep.subr.bf16.mxu0 %v6803_v42  ;;  %v6881_v41 = vld [vmem:[#allocation10 + $0xa7c] ss:$88 sps:$4 sm:$0xff]  }
 0x350   :  { %4964 = vmatprep.subr.bf16.mxu1 %v6806_v43  ;;  %v6884_v42 = vld [vmem:[#allocation10 + $0xbe4] ss:$88 sps:$4 sm:$0xff]   ;;  %v6879_v43 = vld [vmem:[#allocation10 + $0xa78] ss:$88 sps:$4 sm:$0xff]  }
 0x352   :  { %4879 = vmatpush1.bf16.msra.mxu0 %v6801_v44  ;;  %v6882_v44 = vld [vmem:[#allocation10 + $0xbe0] ss:$88 sps:$4 sm:$0xff]  }
 0x353   :  { %4965 = vmatpush1.bf16.msra.mxu1 %v6804_v45  ;;  %4880 = vmatprep.subr.bf16.mxu0 %v6809_v46  ;;  %v6887_v45 = vld [vmem:[#allocation10 + $0xb2c] ss:$88 sps:$4 sm:$0xff]  }
 0x354   :  { %4966 = vmatprep.subr.bf16.mxu1 %v6812_v47  ;;  %v6890_v46 = vld [vmem:[#allocation10 + $0xc94] ss:$88 sps:$4 sm:$0xff]   ;;  %v6885_v47 = vld [vmem:[#allocation10 + $0xb28] ss:$88 sps:$4 sm:$0xff]  }
 0x356   :  { %4881 = vmatpush1.bf16.msra.mxu0 %v6807_v48  ;;  %v6888_v48 = vld [vmem:[#allocation10 + $0xc90] ss:$88 sps:$4 sm:$0xff]  }
 0x357   :  { %4967 = vmatpush1.bf16.msra.mxu1 %v6810_v49  ;;  %4882 = vmatprep.subr.bf16.mxu0 %v6815_v50  ;;  %v6893_v49 = vld [vmem:[#allocation10 + $0xbdc] ss:$88 sps:$4 sm:$0xff]  }
 0x358   :  { %4968 = vmatprep.subr.bf16.mxu1 %v6818_v51  ;;  %v6896_v50 = vld [vmem:[#allocation10 + $0xd44] ss:$88 sps:$4 sm:$0xff]   ;;  %v6891_v51 = vld [vmem:[#allocation10 + $0xbd8] ss:$88 sps:$4 sm:$0xff]  }
 0x35a   :  { %4883 = vmatpush1.bf16.msra.mxu0 %v6813_v54  ;;  %v6894_v54 = vld [vmem:[#allocation10 + $0xd40] ss:$88 sps:$4 sm:$0xff]  }
 0x35b   :  { %4969 = vmatpush1.bf16.msra.mxu1 %v6816_v56  ;;  %4884 = vmatprep.subr.bf16.mxu0 %v6821_v57  ;;  %v6899_v56 = vld [vmem:[#allocation10 + $0xc8c] ss:$88 sps:$4 sm:$0xff]  }
 0x35c   :  { %4970 = vmatprep.subr.bf16.mxu1 %v6824_v58  ;;  %v6902_v57 = vld [vmem:[#allocation10 + $0xdf4] ss:$88 sps:$4 sm:$0xff]   ;;  %v6897_v58 = vld [vmem:[#allocation10 + $0xc88] ss:$88 sps:$4 sm:$0xff]  }
 0x35e   :  { %4885 = vmatpush1.bf16.msra.mxu0 %v6819_v59  ;;  %v6900_v59 = vld [vmem:[#allocation10 + $0xdf0] ss:$88 sps:$4 sm:$0xff]  }
 0x35f   :  { %4971 = vmatpush1.bf16.msra.mxu1 %v6822_v60  ;;  %4886 = vmatprep.subr.bf16.mxu0 %v6827_v62  ;;  %v6905_v60 = vld [vmem:[#allocation10 + $0xd3c] ss:$88 sps:$4 sm:$0xff]  }
 0x360   :  { %4972 = vmatprep.subr.bf16.mxu1 %v6830_v63  ;;  %v6908_v62 = vld [vmem:[#allocation10 + $0xea4] ss:$88 sps:$4 sm:$0xff]   ;;  %v6903_v63 = vld [vmem:[#allocation10 + $0xd38] ss:$88 sps:$4 sm:$0xff]  }
 0x362   :  { %4887 = vmatpush1.bf16.msra.mxu0 %v6825_v1  ;;  %v6906_v1 = vld [vmem:[#allocation10 + $0xea0] ss:$88 sps:$4 sm:$0xff]  }
 0x363   :  { %4973 = vmatpush1.bf16.msra.mxu1 %v6828_v2  ;;  %4888 = vmatprep.subr.bf16.mxu0 %v6833_v3  ;;  %v6911_v2 = vld [vmem:[#allocation10 + $0xdec] ss:$88 sps:$4 sm:$0xff]  }
 0x364   :  { %4974 = vmatprep.subr.bf16.mxu1 %v6836_v4  ;;  %v6914_v3 = vld [vmem:[#allocation10 + $0xf54] ss:$88 sps:$4 sm:$0xff]   ;;  %v6909_v4 = vld [vmem:[#allocation10 + $0xde8] ss:$88 sps:$4 sm:$0xff]  }
 0x366   :  { %4889 = vmatpush1.bf16.msra.mxu0 %v6831_v7  ;;  %v6912_v7 = vld [vmem:[#allocation10 + $0xf50] ss:$88 sps:$4 sm:$0xff]  }
 0x367   :  { %4975 = vmatpush1.bf16.msra.mxu1 %v6834_v9  ;;  %4890 = vmatprep.subr.bf16.mxu0 %v6839_v10  ;;  %v6917_v9 = vld [vmem:[#allocation10 + $0xe9c] ss:$88 sps:$4 sm:$0xff]  }
 0x368   :  { %4976 = vmatprep.subr.bf16.mxu1 %v6842_v11  ;;  %v6920_v10 = vld [vmem:[#allocation10 + $0x1004] ss:$88 sps:$4 sm:$0xff]   ;;  %v6915_v11 = vld [vmem:[#allocation10 + $0xe98] ss:$88 sps:$4 sm:$0xff]  }
 0x36a   :  { %4891 = vmatpush1.bf16.msra.mxu0 %v6837_v12  ;;  %v6918_v12 = vld [vmem:[#allocation10 + $0x1000] ss:$88 sps:$4 sm:$0xff]  }
 0x36b   :  { %4977 = vmatpush1.bf16.msra.mxu1 %v6840_v13  ;;  %4892 = vmatprep.subr.bf16.mxu0 %v6845_v14  ;;  %v6923_v13 = vld [vmem:[#allocation10 + $0xf4c] ss:$88 sps:$4 sm:$0xff]  }
 0x36c   :  { %4978 = vmatprep.subr.bf16.mxu1 %v6848_v15  ;;  %v6926_v14 = vld [vmem:[#allocation10 + $0x10b4] ss:$88 sps:$4 sm:$0xff]   ;;  %v6921_v15 = vld [vmem:[#allocation10 + $0xf48] ss:$88 sps:$4 sm:$0xff]  }
 0x36e   :  { %4893 = vmatpush1.bf16.msra.mxu0 %v6843_v16  ;;  %v6924_v16 = vld [vmem:[#allocation10 + $0x10b0] ss:$88 sps:$4 sm:$0xff]  }
 0x36f   :  { %4979 = vmatpush1.bf16.msra.mxu1 %v6846_v17  ;;  %4894 = vmatprep.subr.bf16.mxu0 %v6851_v18  ;;  %v6929_v17 = vld [vmem:[#allocation10 + $0xffc] ss:$88 sps:$4 sm:$0xff]  }
 0x370   :  { %4980 = vmatprep.subr.bf16.mxu1 %v6854_v19  ;;  %v6932_v18 = vld [vmem:[#allocation10 + $0x1164] ss:$88 sps:$4 sm:$0xff]   ;;  %v6927_v19 = vld [vmem:[#allocation10 + $0xff8] ss:$88 sps:$4 sm:$0xff]  }
 0x372   :  { %4895 = vmatpush1.bf16.msra.mxu0 %v6849_v21  ;;  %v7669_v21 = vsub.s32 4, %v7601_v52 }
 0x373   :  { %4981 = vmatpush1.bf16.msra.mxu1 %v6852_v22  ;;  %4896 = vmatprep.subr.bf16.mxu0 %v6857_v24  ;;  %v6930_v22 = vld [vmem:[#allocation10 + $0x1160] ss:$88 sps:$4 sm:$0xff]   ;;  %v7672_v24 = vsub.s32 5, %v7601_v52 }
 0x374   :  { %4982 = vmatprep.subr.bf16.mxu1 %v6860_v25  ;;  %v6935_v25 = vld [vmem:[#allocation10 + $0x10ac] ss:$88 sps:$4 sm:$0xff]  }
 0x376   :  { %4897 = vmatpush1.bf16.msra.mxu0 %v6855_v26  ;;  %v6938_v26 = vld [vmem:[#allocation10 + $0x1214] ss:$88 sps:$4 sm:$0xff]  }
 0x377   :  { %4983 = vmatpush1.bf16.msra.mxu1 %v6858_v27  ;;  %4898 = vmatprep.subr.bf16.mxu0 %v6863_v28  ;;  %v1399_v27 = vrot.slane %v7650_v6, %v7669_v21  ;;  %v6933_v28 = vld [vmem:[#allocation10 + $0x10a8] ss:$88 sps:$4 sm:$0xff]  }
 0x378   :  { %4984 = vmatprep.subr.bf16.mxu1 %v6866_v29  ;;  %v1403_v29 = vrot.slane %v7650_v6, %v7672_v24 }
 0x37a   :  { %4899 = vmatpush1.bf16.msra.mxu0 %v6861_v30  ;;  %v6936_v30 = vld [vmem:[#allocation10 + $0x1210] ss:$88 sps:$4 sm:$0xff]  }
 0x37b   :  { %4985 = vmatpush1.bf16.msra.mxu1 %v6864_v31  ;;  %4900 = vmatprep.subr.bf16.mxu0 %v6869_v32  ;;  %v6941_v31 = vld [vmem:[#allocation10 + $0x115c] ss:$88 sps:$4 sm:$0xff]  }
 0x37c   :  { %4986 = vmatprep.subr.bf16.mxu1 %v6872_v33  ;;  %v6944_v32 = vld [vmem:[#allocation10 + $0x44] ss:$88 sps:$4 sm:$0xff]  }
 0x37e   :  { %4901 = vmatpush1.bf16.msra.mxu0 %v6867_v34 }
 0x37f   :  { %4987 = vmatpush1.bf16.msra.mxu1 %v6870_v35  ;;  %4902 = vmatprep.subr.bf16.mxu0 %v6875_v36  ;;  %v6939_v36 = vld [vmem:[#allocation10 + $0x1158] ss:$88 sps:$4 sm:$0xff]  }
 0x380   :  { %4997 = vmatprep.subr.bf16.mxu1 %v6878_v37 }
 0x382   :  { %4989 = vmatmul.mubr.bf16.vlgmr.msra.gmra.mrb[24].mxu1 %v7621_v8  ;;  %4903 = vmatpush1.bf16.msra.mxu0 %v6873_v38 }
 0x383   :  { %4998 = vmatpush1.bf16.msra.mxu1 %v6876_v40  ;;  %6137 = vmatprep.mubr.msk.bf16.mxu1 %vm4460_vm2, %v7626_v20  ;;  %v6942_v40 = vld [vmem:[#allocation10 + $0x40] ss:$88 sps:$4 sm:$0xff]  }
 0x384   :  { %4904 = vmatprep.subr.bf16.mxu0 %v6881_v41  ;;  %4999 = vmatprep.subr.bf16.mxu1 %v6884_v42  ;;  %v7449_v41 = vmov 1983009808  }
 0x385   :  { %v5413_v42 = vunpack.c.l.s4 %v7449_v41  ;;  %v6990_v41 = vld [vmem:[#allocation10 + $0x5c0] ss:$88 sps:$4 sm:$0xff]  }
 0x386   :  { %4905 = vmatpush1.bf16.msra.mxu0 %v6879_v43 }
 0x387   :  { %5000 = vmatpush1.bf16.msra.mxu1 %v6882_v44  ;;  %4915 = vmatprep.subr.bf16.mxu0 %v6887_v45  ;;  %v6947_v45 = vld [vmem:[#allocation10 + $0x120c] ss:$88 sps:$4 sm:$0xff]  }
 0x388   :  { %5001 = vmatprep.subr.bf16.mxu1 %v6890_v46  ;;  %v6950_v46 = vld [vmem:[#allocation10 + $0xf4] ss:$88 sps:$4 sm:$0xff]  }
 0x389   :  { %4907 = vmatmul.mubr.bf16.vlgmr.msra.gmra.mrb[16].mxu0 %v7621_v8 }
 0x38a   :  { %4916 = vmatpush1.bf16.msra.mxu0 %v6885_v47  ;;  %6136 = vmatprep.mubr.msk.bf16.mxu0 %vm4460_vm2, %v7626_v20 }
 0x38b   :  { %5002 = vmatpush1.bf16.msra.mxu1 %v6888_v48  ;;  %4917 = vmatprep.subr.bf16.mxu0 %v6893_v49  ;;  %v1391_v48 = vrot.slane %v7650_v6, %v7612_v61  ;;  %v1395_v49 = vrot.slane %v7650_v6, %v7615_v0 }
 0x38c   :  { %5003 = vmatprep.subr.bf16.mxu1 %v6896_v50  ;;  %v6945_v50 = vld [vmem:[#allocation10 + $0x1208] ss:$88 sps:$4 sm:$0xff]  }
 0x38e   :  { %4918 = vmatpush1.bf16.msra.mxu0 %v6891_v51 }
 0x38f   :  { %5004 = vmatpush1.bf16.msra.mxu1 %v6894_v54  ;;  %4919 = vmatprep.subr.bf16.mxu0 %v6899_v56  ;;  %v6948_v54 = vld [vmem:[#allocation10 + $0xf0] ss:$88 sps:$4 sm:$0xff]   ;;  %v6953_v56 = vld [vmem:[#allocation10 + $0x3c] ss:$88 sps:$4 sm:$0xff]  }
 0x390   :  { %5005 = vmatprep.subr.bf16.mxu1 %v6902_v57  ;;  %v5414_v57 = vunpack.c.0.s8 %v5413_v42  ;;  %v6995_v42 = vld [vmem:[#allocation10 + $0x50c] ss:$88 sps:$4 sm:$0xff]  }
 0x392   :  { %4920 = vmatpush1.bf16.msra.mxu0 %v6897_v58 }
 0x393   :  { %5006 = vmatpush1.bf16.msra.mxu1 %v6900_v59  ;;  %4921 = vmatprep.subr.bf16.mxu0 %v6905_v60  ;;  %v6956_v59 = vld [vmem:[#allocation10 + $0x1a4] ss:$88 sps:$4 sm:$0xff]  }
 0x394   :  { %5007 = vmatprep.subr.bf16.mxu1 %v6908_v62 }
 0x396   :  { %4922 = vmatpush1.bf16.msra.mxu0 %v6903_v63 }
 0x397   :  { %5008 = vmatpush1.bf16.msra.mxu1 %v6906_v1  ;;  %4923 = vmatprep.subr.bf16.mxu0 %v6911_v2  ;;  %v6951_v2 = vld [vmem:[#allocation10 + $0x38] ss:$88 sps:$4 sm:$0xff]  }
 0x398   :  { %5009 = vmatprep.subr.bf16.mxu1 %v6914_v3 }
 0x39a   :  { %4924 = vmatpush1.bf16.msra.mxu0 %v6909_v4  ;;  %v6954_v4 = vld [vmem:[#allocation10 + $0x1a0] ss:$88 sps:$4 sm:$0xff]  }
 0x39b   :  { %5010 = vmatpush1.bf16.msra.mxu1 %v6912_v7  ;;  %4925 = vmatprep.subr.bf16.mxu0 %v6917_v9  ;;  %v6959_v7 = vld [vmem:[#allocation10 + $0xec] ss:$88 sps:$4 sm:$0xff]   ;;  %v7687_v9 = vsub.s32 %v5414_v57, %v7601_v52  ;;  %v7008_v57 = vld [vmem:[#allocation10 + $0x7d0] ss:$88 sps:$4 sm:$0xff]  }
 0x39c   :  { %5011 = vmatprep.subr.bf16.mxu1 %v6920_v10 }
 0x39e   :  { %4926 = vmatpush1.bf16.msra.mxu0 %v6915_v11  ;;  %v6962_v11 = vld [vmem:[#allocation10 + $0x254] ss:$88 sps:$4 sm:$0xff]  }
 0x39f   :  { %5012 = vmatpush1.bf16.msra.mxu1 %v6918_v12  ;;  %4927 = vmatprep.subr.bf16.mxu0 %v6923_v13  ;;  %v6957_v13 = vld [vmem:[#allocation10 + $0xe8] ss:$88 sps:$4 sm:$0xff]  }
 0x3a0   :  { %5013 = vmatprep.subr.bf16.mxu1 %v6926_v14  ;;  %v6960_v14 = vld [vmem:[#allocation10 + $0x250] ss:$88 sps:$4 sm:$0xff]  }
 0x3a2   :  { %4928 = vmatpush1.bf16.msra.mxu0 %v6921_v15  ;;  %v6965_v15 = vld [vmem:[#allocation10 + $0x19c] ss:$88 sps:$4 sm:$0xff]  }
 0x3a3   :  { %5014 = vmatpush1.bf16.msra.mxu1 %v6924_v16  ;;  %4929 = vmatprep.subr.bf16.mxu0 %v6929_v17  ;;  %v5418_v16 = vrot.slane %v7659_v39, %v7687_v9  ;;  %v6972_v39 = vld [vmem:[#allocation10 + $0x3b0] ss:$88 sps:$4 sm:$0xff]  }
 0x3a4   :  { %5015 = vmatprep.subr.bf16.mxu1 %v6932_v18  ;;  %v6968_v18 = vld [vmem:[#allocation10 + $0x304] ss:$88 sps:$4 sm:$0xff]  }
 0x3a6   :  { %4930 = vmatpush1.bf16.msra.mxu0 %v6927_v19 }
 0x3a7   :  { %5016 = vmatpush1.bf16.msra.mxu1 %v6930_v22  ;;  %4931 = vmatprep.subr.bf16.mxu0 %v6935_v25  ;;  %v6963_v22 = vld [vmem:[#allocation10 + $0x198] ss:$88 sps:$4 sm:$0xff]  }
 0x3a8   :  { %5017 = vmatprep.subr.bf16.mxu1 %v6938_v26  ;;  %v6966_v25 = vld [vmem:[#allocation10 + $0x300] ss:$88 sps:$4 sm:$0xff]   ;;  %v6971_v26 = vld [vmem:[#allocation10 + $0x24c] ss:$88 sps:$4 sm:$0xff]  }
 0x3a9   :  { %v4703_v33 = vpop.f32.mrb[16].mxu1 }
 0x3aa   :  { %v6282_v34 = vadd.f32 %v4703_v33, %v1399_v27  ;;  %v4705_v35 = vpop.f32.mrb[17].mxu1  ;;  %4932 = vmatpush1.bf16.msra.mxu0 %v6933_v28  ;;  %v6974_v27 = vld [vmem:[#allocation10 + $0x3b4] ss:$88 sps:$4 sm:$0xff]   ;;  %v6969_v28 = vld [vmem:[#allocation10 + $0x248] ss:$88 sps:$4 sm:$0xff]  }
 0x3ab   :  { %v6283_v37 = vadd.f32 %v4705_v35, %v1403_v29  ;;  %v4707_v38 = vpop.f32.mrb[18].mxu1  ;;  %5018 = vmatpush1.bf16.msra.mxu1 %v6936_v30  ;;  %4933 = vmatprep.subr.bf16.mxu0 %v6941_v31  ;;  %v6977_v29 = vld [vmem:[#allocation10 + $0x2fc] ss:$88 sps:$4 sm:$0xff]   ;;  %v6975_v31 = vld [vmem:[#allocation10 + $0x2f8] ss:$88 sps:$4 sm:$0xff]  }
 0x3ac   :  { %v5370_v43 = vmax.f32 %v6282_v34, 0.0  ;;  %v4708_v44 = vpop.f32.mrb[19].mxu1  ;;  %5120 = vmatprep.subr.bf16.mxu1 %v6944_v32  ;;  %v6980_v30 = vld [vmem:[#allocation10 + $0x464] ss:$88 sps:$4 sm:$0xff]   ;;  %v6978_v32 = vld [vmem:[#allocation10 + $0x460] ss:$88 sps:$4 sm:$0xff]  }
 0x3ad   :  { %v5371_v47 = vmax.f32 %v6283_v37, 0.0  ;;  %v6983_v33 = vld [vmem:[#allocation10 + $0x3ac] ss:$88 sps:$4 sm:$0xff]   ;;  %v6981_v35 = vld [vmem:[#allocation10 + $0x3a8] ss:$88 sps:$4 sm:$0xff]  }
 0x3ae   :  { %5030 = vmatmul.mubr.bf16.vlgmr.msra.gmra.mrb[24].mxu1 %v7628_v23  ;;  %4934 = vmatpush1.bf16.msra.mxu0 %v6939_v36  ;;  %v6986_v34 = vld [vmem:[#allocation10 + $0x514] ss:$88 sps:$4 sm:$0xff]   ;;  %v6984_v36 = vld [vmem:[#allocation10 + $0x510] ss:$88 sps:$4 sm:$0xff]   ;;  %v6992_v38 = vld [vmem:[#allocation10 + $0x5c4] ss:$88 sps:$4 sm:$0xff]  }
 0x3af   :  { %v7683_v51 = vcombine.low %v5370_v43, %v5371_v47  ;;  %5121 = vmatpush1.bf16.msra.mxu1 %v6942_v40  ;;  %5152 = vmatprep.mubr.bf16.mxu1 %v7618_v5  ;;  %v6989_v37 = vld [vmem:[#allocation10 + $0x45c] ss:$88 sps:$4 sm:$0xff]   ;;  %v6987_v40 = vld [vmem:[#allocation10 + $0x458] ss:$88 sps:$4 sm:$0xff]   ;;  %v6993_v44 = vld [vmem:[#allocation10 + $0x508] ss:$88 sps:$4 sm:$0xff]  }
 0x3b0   :  { %v4621_v58 = vpop.f32.mrb[8].mxu0  ;;  %4935 = vmatprep.subr.bf16.mxu0 %v6947_v45  ;;  %5122 = vmatprep.subr.bf16.mxu1 %v6950_v46  ;;  %v6998_v43 = vld [vmem:[#allocation10 + $0x674] ss:$88 sps:$4 sm:$0xff]   ;;  %v6996_v45 = vld [vmem:[#allocation10 + $0x670] ss:$88 sps:$4 sm:$0xff]  }
 0x3b1   :  { %v6280_v60 = vadd.f32 %v4621_v58, %v1391_v48  ;;  %v4623_v62 = vpop.f32.mrb[9].mxu0  ;;  %v7001_v46 = vld [vmem:[#allocation10 + $0x5bc] ss:$88 sps:$4 sm:$0xff]   ;;  %v6999_v48 = vld [vmem:[#allocation10 + $0x5b8] ss:$88 sps:$4 sm:$0xff]  }
 0x3b2   :  { %v6281_v63 = vadd.f32 %v4623_v62, %v1395_v49  ;;  %v4625_v1 = vpop.f32.mrb[10].mxu0  ;;  %4936 = vmatpush1.bf16.msra.mxu0 %v6945_v50  ;;  %v7004_v47 = vld [vmem:[#allocation10 + $0x724] ss:$88 sps:$4 sm:$0xff]   ;;  %v7002_v49 = vld [vmem:[#allocation10 + $0x720] ss:$88 sps:$4 sm:$0xff]  }
 0x3b3   :  { %v5368_v6 = vmax.f32 %v6280_v60, 0.0  ;;  %5123 = vmatpush1.bf16.msra.mxu1 %v6948_v54  ;;  %v4626_v3 = vpop.f32.mrb[11].mxu0  ;;  %5038 = vmatprep.subr.bf16.mxu0 %v6953_v56  ;;  %v7007_v50 = vld [vmem:[#allocation10 + $0x66c] ss:$88 sps:$4 sm:$0xff]   ;;  %v7005_v56 = vld [vmem:[#allocation10 + $0x668] ss:$88 sps:$4 sm:$0xff]  }
 0x3b4   :  { %v5369_v10 = vmax.f32 %v6281_v63, 0.0  ;;  %5124 = vmatprep.subr.bf16.mxu1 %v6956_v59  ;;  %v7010_v54 = vld [vmem:[#allocation10 + $0x7d4] ss:$88 sps:$4 sm:$0xff]   ;;  %v7016_v59 = vld [vmem:[#allocation10 + $0x884] ss:$88 sps:$4 sm:$0xff]  }
 0x3b5   :  { %4948 = vmatmul.mubr.bf16.vlgmr.msra.gmra.mrb[16].mxu0 %v7628_v23  ;;  %v7013_v58 = vld [vmem:[#allocation10 + $0x71c] ss:$88 sps:$4 sm:$0xff]   ;;  %v7011_v60 = vld [vmem:[#allocation10 + $0x718] ss:$88 sps:$4 sm:$0xff]   ;;  %v7019_v63 = vld [vmem:[#allocation10 + $0x7cc] ss:$88 sps:$4 sm:$0xff]  }
 0x3b6   :  { %v5411_v12 = vcombine.low %v5368_v6, %v5369_v10  ;;  %5039 = vmatpush1.bf16.msra.mxu0 %v6951_v2  ;;  %5070 = vmatprep.mubr.bf16.mxu0 %v7618_v5  ;;  %v7014_v62 = vld [vmem:[#allocation10 + $0x880] ss:$88 sps:$4 sm:$0xff]   ;;  %v7022_v1 = vld [vmem:[#allocation10 + $0x934] ss:$88 sps:$4 sm:$0xff]   ;;  %v7020_v6 = vld [vmem:[#allocation10 + $0x930] ss:$88 sps:$4 sm:$0xff]  }
 0x3b7   :  { %5125 = vmatpush1.bf16.msra.mxu1 %v6954_v4  ;;  %5040 = vmatprep.subr.bf16.mxu0 %v6959_v7  ;;  %v7017_v2 = vld [vmem:[#allocation10 + $0x7c8] ss:$88 sps:$4 sm:$0xff]   ;;  %v7025_v3 = vld [vmem:[#allocation10 + $0x87c] ss:$88 sps:$4 sm:$0xff]   ;;  %v7023_v7 = vld [vmem:[#allocation10 + $0x878] ss:$88 sps:$4 sm:$0xff]  }
 0x3b8   :  { %v5425_v17 = vrot.slane %v5411_v12, %v7687_v9  ;;  %5126 = vmatprep.subr.bf16.mxu1 %v6962_v11  ;;  %v7028_v4 = vld [vmem:[#allocation10 + $0x9e4] ss:$88 sps:$4 sm:$0xff]   ;;  %v7026_v10 = vld [vmem:[#allocation10 + $0x9e0] ss:$88 sps:$4 sm:$0xff]   ;;  %v7034_v12 = vld [vmem:[#allocation10 + $0xa94] ss:$88 sps:$4 sm:$0xff]  }
 0x3b9   :  { %v7031_v11 = vld [vmem:[#allocation10 + $0x92c] ss:$88 sps:$4 sm:$0xff]  }
 0x3ba   :  { %v5426_v19 = vcombine.low %v5418_v16, %v5425_v17  ;;  %5041 = vmatpush1.bf16.msra.mxu0 %v6957_v13  ;;  %v7029_v13 = vld [vmem:[#allocation10 + $0x928] ss:$88 sps:$4 sm:$0xff]   ;;  %v7040_v16 = vld [vmem:[#allocation10 + $0xb44] ss:$88 sps:$4 sm:$0xff]   ;;  %v7035_v17 = vld [vmem:[#allocation10 + $0x9d8] ss:$88 sps:$4 sm:$0xff]  }
 0x3bb   :  { %5127 = vmatpush1.bf16.msra.mxu1 %v6960_v14  ;;  %5042 = vmatprep.subr.bf16.mxu0 %v6965_v15  ;;  %v7032_v14 = vld [vmem:[#allocation10 + $0xa90] ss:$88 sps:$4 sm:$0xff]   ;;  %v7037_v15 = vld [vmem:[#allocation10 + $0x9dc] ss:$88 sps:$4 sm:$0xff]  }
 0x3bc   :  { %5509 = vst [vmem:[%s7782_s7] sm:$0xff] %v5426_v19  ;;  %5128 = vmatprep.subr.bf16.mxu1 %v6968_v18  ;;  %v7038_v18 = vld [vmem:[#allocation10 + $0xb40] ss:$88 sps:$4 sm:$0xff]   ;;  %v7043_v19 = vld [vmem:[#allocation10 + $0xa8c] ss:$88 sps:$4 sm:$0xff]  }
 0x3be   :  { %5043 = vmatpush1.bf16.msra.mxu0 %v6963_v22  ;;  %v7046_v22 = vld [vmem:[#allocation10 + $0xbf4] ss:$88 sps:$4 sm:$0xff]  }
 0x3bf   :  { %5129 = vmatpush1.bf16.msra.mxu1 %v6966_v25  ;;  %5044 = vmatprep.subr.bf16.mxu0 %v6971_v26  ;;  %v7041_v25 = vld [vmem:[#allocation10 + $0xa88] ss:$88 sps:$4 sm:$0xff]  }
 0x3c0   :  { %5130 = vmatprep.subr.bf16.mxu1 %v6974_v27  ;;  %v7044_v26 = vld [vmem:[#allocation10 + $0xbf0] ss:$88 sps:$4 sm:$0xff]   ;;  %v7049_v27 = vld [vmem:[#allocation10 + $0xb3c] ss:$88 sps:$4 sm:$0xff]  }
 0x3c2   :  { %5045 = vmatpush1.bf16.msra.mxu0 %v6969_v28  ;;  %v7052_v28 = vld [vmem:[#allocation10 + $0xca4] ss:$88 sps:$4 sm:$0xff]  }
 0x3c3   :  { %5131 = vmatpush1.bf16.msra.mxu1 %v6972_v39  ;;  %5046 = vmatprep.subr.bf16.mxu0 %v6977_v29  ;;  %v7047_v39 = vld [vmem:[#allocation10 + $0xb38] ss:$88 sps:$4 sm:$0xff]  }
 0x3c4   :  { %5132 = vmatprep.subr.bf16.mxu1 %v6980_v30  ;;  %v7050_v29 = vld [vmem:[#allocation10 + $0xca0] ss:$88 sps:$4 sm:$0xff]   ;;  %v7055_v30 = vld [vmem:[#allocation10 + $0xbec] ss:$88 sps:$4 sm:$0xff]  }
 0x3c6   :  { %5047 = vmatpush1.bf16.msra.mxu0 %v6975_v31  ;;  %v7058_v31 = vld [vmem:[#allocation10 + $0xd54] ss:$88 sps:$4 sm:$0xff]  }
 0x3c7   :  { %5133 = vmatpush1.bf16.msra.mxu1 %v6978_v32  ;;  %5048 = vmatprep.subr.bf16.mxu0 %v6983_v33  ;;  %v7053_v32 = vld [vmem:[#allocation10 + $0xbe8] ss:$88 sps:$4 sm:$0xff]  }
 0x3c8   :  { %5134 = vmatprep.subr.bf16.mxu1 %v6986_v34  ;;  %v7056_v33 = vld [vmem:[#allocation10 + $0xd50] ss:$88 sps:$4 sm:$0xff]   ;;  %v7061_v34 = vld [vmem:[#allocation10 + $0xc9c] ss:$88 sps:$4 sm:$0xff]  }
 0x3ca   :  { %5049 = vmatpush1.bf16.msra.mxu0 %v6981_v35  ;;  %v7064_v35 = vld [vmem:[#allocation10 + $0xe04] ss:$88 sps:$4 sm:$0xff]  }
 0x3cb   :  { %5135 = vmatpush1.bf16.msra.mxu1 %v6984_v36  ;;  %5050 = vmatprep.subr.bf16.mxu0 %v6989_v37  ;;  %v7059_v36 = vld [vmem:[#allocation10 + $0xc98] ss:$88 sps:$4 sm:$0xff]  }
 0x3cc   :  { %5136 = vmatprep.subr.bf16.mxu1 %v6992_v38  ;;  %v7062_v37 = vld [vmem:[#allocation10 + $0xe00] ss:$88 sps:$4 sm:$0xff]   ;;  %v7067_v38 = vld [vmem:[#allocation10 + $0xd4c] ss:$88 sps:$4 sm:$0xff]  }
 0x3ce   :  { %5051 = vmatpush1.bf16.msra.mxu0 %v6987_v40  ;;  %v7070_v40 = vld [vmem:[#allocation10 + $0xeb4] ss:$88 sps:$4 sm:$0xff]  }
 0x3cf   :  { %5137 = vmatpush1.bf16.msra.mxu1 %v6990_v41  ;;  %5052 = vmatprep.subr.bf16.mxu0 %v6995_v42  ;;  %v7065_v41 = vld [vmem:[#allocation10 + $0xd48] ss:$88 sps:$4 sm:$0xff]  }
 0x3d0   :  { %5138 = vmatprep.subr.bf16.mxu1 %v6998_v43  ;;  %v7068_v42 = vld [vmem:[#allocation10 + $0xeb0] ss:$88 sps:$4 sm:$0xff]   ;;  %v7073_v43 = vld [vmem:[#allocation10 + $0xdfc] ss:$88 sps:$4 sm:$0xff]  }
 0x3d2   :  { %5053 = vmatpush1.bf16.msra.mxu0 %v6993_v44  ;;  %v7076_v44 = vld [vmem:[#allocation10 + $0xf64] ss:$88 sps:$4 sm:$0xff]  }
 0x3d3   :  { %5139 = vmatpush1.bf16.msra.mxu1 %v6996_v45  ;;  %5054 = vmatprep.subr.bf16.mxu0 %v7001_v46  ;;  %v7071_v45 = vld [vmem:[#allocation10 + $0xdf8] ss:$88 sps:$4 sm:$0xff]  }
 0x3d4   :  { %5140 = vmatprep.subr.bf16.mxu1 %v7004_v47  ;;  %v7074_v46 = vld [vmem:[#allocation10 + $0xf60] ss:$88 sps:$4 sm:$0xff]   ;;  %v7079_v47 = vld [vmem:[#allocation10 + $0xeac] ss:$88 sps:$4 sm:$0xff]  }
 0x3d6   :  { %5055 = vmatpush1.bf16.msra.mxu0 %v6999_v48  ;;  %v7082_v48 = vld [vmem:[#allocation10 + $0x1014] ss:$88 sps:$4 sm:$0xff]  }
 0x3d7   :  { %5141 = vmatpush1.bf16.msra.mxu1 %v7002_v49  ;;  %5056 = vmatprep.subr.bf16.mxu0 %v7007_v50  ;;  %v7077_v49 = vld [vmem:[#allocation10 + $0xea8] ss:$88 sps:$4 sm:$0xff]  }
 0x3d8   :  { %5142 = vmatprep.subr.bf16.mxu1 %v7010_v54  ;;  %v7080_v50 = vld [vmem:[#allocation10 + $0x1010] ss:$88 sps:$4 sm:$0xff]   ;;  %v7085_v54 = vld [vmem:[#allocation10 + $0xf5c] ss:$88 sps:$4 sm:$0xff]  }
 0x3da   :  { %5057 = vmatpush1.bf16.msra.mxu0 %v7005_v56  ;;  %v7088_v56 = vld [vmem:[#allocation10 + $0x10c4] ss:$88 sps:$4 sm:$0xff]  }
 0x3db   :  { %5143 = vmatpush1.bf16.msra.mxu1 %v7008_v57  ;;  %5058 = vmatprep.subr.bf16.mxu0 %v7013_v58  ;;  %v7083_v57 = vld [vmem:[#allocation10 + $0xf58] ss:$88 sps:$4 sm:$0xff]  }
 0x3dc   :  { %5144 = vmatprep.subr.bf16.mxu1 %v7016_v59  ;;  %v7086_v58 = vld [vmem:[#allocation10 + $0x10c0] ss:$88 sps:$4 sm:$0xff]   ;;  %v7091_v59 = vld [vmem:[#allocation10 + $0x100c] ss:$88 sps:$4 sm:$0xff]  }
 0x3de   :  { %5059 = vmatpush1.bf16.msra.mxu0 %v7011_v60  ;;  %v7094_v60 = vld [vmem:[#allocation10 + $0x1174] ss:$88 sps:$4 sm:$0xff]  }
 0x3df   :  { %5145 = vmatpush1.bf16.msra.mxu1 %v7014_v62  ;;  %5060 = vmatprep.subr.bf16.mxu0 %v7019_v63  ;;  %v7089_v62 = vld [vmem:[#allocation10 + $0x1008] ss:$88 sps:$4 sm:$0xff]  }
 0x3e0   :  { %5146 = vmatprep.subr.bf16.mxu1 %v7022_v1  ;;  %v7092_v63 = vld [vmem:[#allocation10 + $0x1170] ss:$88 sps:$4 sm:$0xff]   ;;  %v7703_v1 = vld [vmem:[#allocation12 + $0x8] sm:$0xff] }
 0x3e2   :  { %5061 = vmatpush1.bf16.msra.mxu0 %v7017_v2  ;;  %v7097_v2 = vld [vmem:[#allocation10 + $0x10bc] ss:$88 sps:$4 sm:$0xff]  }
 0x3e3   :  { %5147 = vmatpush1.bf16.msra.mxu1 %v7020_v6  ;;  %5062 = vmatprep.subr.bf16.mxu0 %v7025_v3  ;;  %v7100_v6 = vld [vmem:[#allocation10 + $0x1224] ss:$88 sps:$4 sm:$0xff]   ;;  %v1415_v3 = vrot.slane %v7703_v1, %v7604_v53 }
 0x3e4   :  { %5148 = vmatprep.subr.bf16.mxu1 %v7028_v4  ;;  %v7095_v4 = vld [vmem:[#allocation10 + $0x10b8] ss:$88 sps:$4 sm:$0xff]  }
 0x3e6   :  { %5063 = vmatpush1.bf16.msra.mxu0 %v7023_v7  ;;  %v1419_v7 = vrot.slane %v7703_v1, %v7607_v55 }
 0x3e7   :  { %5149 = vmatpush1.bf16.msra.mxu1 %v7026_v10  ;;  %5064 = vmatprep.subr.bf16.mxu0 %v7031_v11  ;;  %v7098_v10 = vld [vmem:[#allocation10 + $0x1220] ss:$88 sps:$4 sm:$0xff]   ;;  %v7103_v11 = vld [vmem:[#allocation10 + $0x116c] ss:$88 sps:$4 sm:$0xff]  }
 0x3e8   :  { %5150 = vmatprep.subr.bf16.mxu1 %v7034_v12  ;;  %v7106_v12 = vld [vmem:[#allocation10 + $0x54] ss:$88 sps:$4 sm:$0xff]  }
 0x3ea   :  { %5065 = vmatpush1.bf16.msra.mxu0 %v7029_v13 }
 0x3eb   :  { %5151 = vmatpush1.bf16.msra.mxu1 %v7032_v14  ;;  %5066 = vmatprep.subr.bf16.mxu0 %v7037_v15  ;;  %v1406_v14 = vsub.s32 6, %v7601_v52 }
 0x3ec   :  { %5161 = vmatprep.subr.bf16.mxu1 %v7040_v16 }
 0x3ee   :  { %5153 = vmatmul.mubr.bf16.vlgmr.msra.gmra.mrb[28].mxu1 %v7621_v8  ;;  %5067 = vmatpush1.bf16.msra.mxu0 %v7035_v17  ;;  %v7101_v17 = vld [vmem:[#allocation10 + $0x1168] ss:$88 sps:$4 sm:$0xff]  }
 0x3ef   :  { %5162 = vmatpush1.bf16.msra.mxu1 %v7038_v18  ;;  %6139 = vmatprep.mubr.msk.bf16.mxu1 %vm4460_vm2, %v7626_v20  ;;  %v1410_v18 = vsub.s32 7, %v7601_v52 }
 0x3f0   :  { %5068 = vmatprep.subr.bf16.mxu0 %v7043_v19  ;;  %5163 = vmatprep.subr.bf16.mxu1 %v7046_v22 }
 0x3f2   :  { %5069 = vmatpush1.bf16.msra.mxu0 %v7041_v25  ;;  %v7104_v25 = vld [vmem:[#allocation10 + $0x50] ss:$88 sps:$4 sm:$0xff]  }
 0x3f3   :  { %5164 = vmatpush1.bf16.msra.mxu1 %v7044_v26  ;;  %5079 = vmatprep.subr.bf16.mxu0 %v7049_v27 }
 0x3f4   :  { %5165 = vmatprep.subr.bf16.mxu1 %v7052_v28  ;;  %v7109_v28 = vld [vmem:[#allocation10 + $0x121c] ss:$88 sps:$4 sm:$0xff]  }
 0x3f5   :  { %5071 = vmatmul.mubr.bf16.vlgmr.msra.gmra.mrb[20].mxu0 %v7621_v8 }
 0x3f6   :  { %5080 = vmatpush1.bf16.msra.mxu0 %v7047_v39  ;;  %6138 = vmatprep.mubr.msk.bf16.mxu0 %vm4460_vm2, %v7626_v20  ;;  %v7112_v39 = vld [vmem:[#allocation10 + $0x104] ss:$88 sps:$4 sm:$0xff]  }
 0x3f7   :  { %5166 = vmatpush1.bf16.msra.mxu1 %v7050_v29  ;;  %5081 = vmatprep.subr.bf16.mxu0 %v7055_v30  ;;  %v7269_v30 = vld [vmem:[#allocation12] sm:$0xff] }
 0x3f8   :  { %5167 = vmatprep.subr.bf16.mxu1 %v7058_v31  ;;  %v1407_v31 = vrot.slane %v7269_v30, %v1406_v14 }
 0x3fa   :  { %5082 = vmatpush1.bf16.msra.mxu0 %v7053_v32  ;;  %v1411_v32 = vrot.slane %v7269_v30, %v1410_v18  ;;  %v7163_v30 = vld [vmem:[#allocation10 + $0x5cc] ss:$88 sps:$4 sm:$0xff]  }
 0x3fb   :  { %5168 = vmatpush1.bf16.msra.mxu1 %v7056_v33  ;;  %5083 = vmatprep.subr.bf16.mxu0 %v7061_v34  ;;  %v7107_v33 = vld [vmem:[#allocation10 + $0x1218] ss:$88 sps:$4 sm:$0xff]  }
 0x3fc   :  { %5169 = vmatprep.subr.bf16.mxu1 %v7064_v35  ;;  %v7110_v35 = vld [vmem:[#allocation10 + $0x100] ss:$88 sps:$4 sm:$0xff]  }
 0x3fe   :  { %5084 = vmatpush1.bf16.msra.mxu0 %v7059_v36  ;;  %v7115_v36 = vld [vmem:[#allocation10 + $0x4c] ss:$88 sps:$4 sm:$0xff]  }
 0x3ff   :  { %5170 = vmatpush1.bf16.msra.mxu1 %v7062_v37  ;;  %5085 = vmatprep.subr.bf16.mxu0 %v7067_v38  ;;  %v7118_v38 = vld [vmem:[#allocation10 + $0x1b4] ss:$88 sps:$4 sm:$0xff]  }
 0x400   :  { %5171 = vmatprep.subr.bf16.mxu1 %v7070_v40 }
 0x402   :  { %5086 = vmatpush1.bf16.msra.mxu0 %v7065_v41 }
 0x403   :  { %5172 = vmatpush1.bf16.msra.mxu1 %v7068_v42  ;;  %5087 = vmatprep.subr.bf16.mxu0 %v7073_v43 }
 0x404   :  { %5173 = vmatprep.subr.bf16.mxu1 %v7076_v44  ;;  %v7113_v44 = vld [vmem:[#allocation10 + $0x48] ss:$88 sps:$4 sm:$0xff]  }
 0x406   :  { %5088 = vmatpush1.bf16.msra.mxu0 %v7071_v45 }
 0x407   :  { %5174 = vmatpush1.bf16.msra.mxu1 %v7074_v46  ;;  %5089 = vmatprep.subr.bf16.mxu0 %v7079_v47  ;;  %v7116_v47 = vld [vmem:[#allocation10 + $0x1b0] ss:$88 sps:$4 sm:$0xff]  }
 0x408   :  { %5175 = vmatprep.subr.bf16.mxu1 %v7082_v48  ;;  %v7121_v48 = vld [vmem:[#allocation10 + $0xfc] ss:$88 sps:$4 sm:$0xff]  }
 0x40a   :  { %5090 = vmatpush1.bf16.msra.mxu0 %v7077_v49 }
 0x40b   :  { %5176 = vmatpush1.bf16.msra.mxu1 %v7080_v50  ;;  %5091 = vmatprep.subr.bf16.mxu0 %v7085_v54  ;;  %v7124_v50 = vld [vmem:[#allocation10 + $0x264] ss:$88 sps:$4 sm:$0xff]  }
 0x40c   :  { %5177 = vmatprep.subr.bf16.mxu1 %v7088_v56  ;;  %v7119_v56 = vld [vmem:[#allocation10 + $0xf8] ss:$88 sps:$4 sm:$0xff]  }
 0x40e   :  { %5092 = vmatpush1.bf16.msra.mxu0 %v7083_v57  ;;  %v7122_v57 = vld [vmem:[#allocation10 + $0x260] ss:$88 sps:$4 sm:$0xff]  }
 0x40f   :  { %5178 = vmatpush1.bf16.msra.mxu1 %v7086_v58  ;;  %5093 = vmatprep.subr.bf16.mxu0 %v7091_v59  ;;  %v7127_v58 = vld [vmem:[#allocation10 + $0x1ac] ss:$88 sps:$4 sm:$0xff]   ;;  %v5435_v59 = vrot.slane %v7683_v51, %v7687_v9  ;;  %v7134_v51 = vld [vmem:[#allocation10 + $0x3c0] ss:$88 sps:$4 sm:$0xff]  }
 0x410   :  { %5179 = vmatprep.subr.bf16.mxu1 %v7094_v60 }
 0x412   :  { %5094 = vmatpush1.bf16.msra.mxu0 %v7089_v62  ;;  %v7130_v62 = vld [vmem:[#allocation10 + $0x314] ss:$88 sps:$4 sm:$0xff]  }
 0x413   :  { %5180 = vmatpush1.bf16.msra.mxu1 %v7092_v63  ;;  %5095 = vmatprep.subr.bf16.mxu0 %v7097_v2  ;;  %v7125_v2 = vld [vmem:[#allocation10 + $0x1a8] ss:$88 sps:$4 sm:$0xff]  }
 0x414   :  { %5181 = vmatprep.subr.bf16.mxu1 %v7100_v6  ;;  %v7128_v6 = vld [vmem:[#allocation10 + $0x310] ss:$88 sps:$4 sm:$0xff]  }
 0x415   :  { %v4867_v13 = vpop.f32.mrb[20].mxu1 }
 0x416   :  { %v6286_v15 = vadd.f32 %v4867_v13, %v1415_v3  ;;  %v4869_v16 = vpop.f32.mrb[21].mxu1  ;;  %5096 = vmatpush1.bf16.msra.mxu0 %v7095_v4  ;;  %v7133_v3 = vld [vmem:[#allocation10 + $0x25c] ss:$88 sps:$4 sm:$0xff]   ;;  %v7131_v4 = vld [vmem:[#allocation10 + $0x258] ss:$88 sps:$4 sm:$0xff]  }
 0x417   :  { %v6287_v19 = vadd.f32 %v4869_v16, %v1419_v7  ;;  %v4871_v22 = vpop.f32.mrb[22].mxu1  ;;  %5182 = vmatpush1.bf16.msra.mxu1 %v7098_v10  ;;  %5097 = vmatprep.subr.bf16.mxu0 %v7103_v11  ;;  %v7139_v7 = vld [vmem:[#allocation10 + $0x30c] ss:$88 sps:$4 sm:$0xff]   ;;  %v7137_v11 = vld [vmem:[#allocation10 + $0x308] ss:$88 sps:$4 sm:$0xff]  }
 0x418   :  { %v5374_v26 = vmax.f32 %v6286_v15, 0.0  ;;  %v4872_v27 = vpop.f32.mrb[23].mxu1  ;;  %5284 = vmatprep.subr.bf16.mxu1 %v7106_v12  ;;  %v7142_v10 = vld [vmem:[#allocation10 + $0x474] ss:$88 sps:$4 sm:$0xff]   ;;  %v7140_v12 = vld [vmem:[#allocation10 + $0x470] ss:$88 sps:$4 sm:$0xff]  }
 0x419   :  { %v5375_v29 = vmax.f32 %v6287_v19, 0.0  ;;  %v7145_v13 = vld [vmem:[#allocation10 + $0x3bc] ss:$88 sps:$4 sm:$0xff]   ;;  %v7143_v16 = vld [vmem:[#allocation10 + $0x3b8] ss:$88 sps:$4 sm:$0xff]  }
 0x41a   :  { %5194 = vmatmul.mubr.bf16.vlgmr.msra.gmra.mrb[28].mxu1 %v7628_v23  ;;  %5098 = vmatpush1.bf16.msra.mxu0 %v7101_v17  ;;  %v7148_v15 = vld [vmem:[#allocation10 + $0x524] ss:$88 sps:$4 sm:$0xff]   ;;  %v7146_v17 = vld [vmem:[#allocation10 + $0x520] ss:$88 sps:$4 sm:$0xff]   ;;  %v7154_v22 = vld [vmem:[#allocation10 + $0x5d4] ss:$88 sps:$4 sm:$0xff]  }
 0x41b   :  { %v7716_v34 = vcombine.low %v5374_v26, %v5375_v29  ;;  %5285 = vmatpush1.bf16.msra.mxu1 %v7104_v25  ;;  %5316 = vmatprep.mubr.bf16.mxu1 %v7618_v5  ;;  %v7151_v19 = vld [vmem:[#allocation10 + $0x46c] ss:$88 sps:$4 sm:$0xff]   ;;  %v7149_v25 = vld [vmem:[#allocation10 + $0x468] ss:$88 sps:$4 sm:$0xff]   ;;  %v7157_v27 = vld [vmem:[#allocation10 + $0x51c] ss:$88 sps:$4 sm:$0xff]  }
 0x41c   :  { %v4785_v37 = vpop.f32.mrb[12].mxu0  ;;  %5099 = vmatprep.subr.bf16.mxu0 %v7109_v28  ;;  %5286 = vmatprep.subr.bf16.mxu1 %v7112_v39  ;;  %v7152_v26 = vld [vmem:[#allocation10 + $0x5d0] ss:$88 sps:$4 sm:$0xff]   ;;  %v7160_v28 = vld [vmem:[#allocation10 + $0x684] ss:$88 sps:$4 sm:$0xff]  }
 0x41d   :  { %v6284_v40 = vadd.f32 %v4785_v37, %v1407_v31  ;;  %v4787_v41 = vpop.f32.mrb[13].mxu0  ;;  %v7155_v39 = vld [vmem:[#allocation10 + $0x518] ss:$88 sps:$4 sm:$0xff]   ;;  %v7166_v31 = vld [vmem:[#allocation10 + $0x734] ss:$88 sps:$4 sm:$0xff]  }
 0x41e   :  { %v6285_v42 = vadd.f32 %v4787_v41, %v1411_v32  ;;  %v4789_v43 = vpop.f32.mrb[14].mxu0  ;;  %5100 = vmatpush1.bf16.msra.mxu0 %v7107_v33  ;;  %v7158_v29 = vld [vmem:[#allocation10 + $0x680] ss:$88 sps:$4 sm:$0xff]   ;;  %v7164_v33 = vld [vmem:[#allocation10 + $0x730] ss:$88 sps:$4 sm:$0xff]  }
 0x41f   :  { %v5372_v45 = vmax.f32 %v6284_v40, 0.0  ;;  %5287 = vmatpush1.bf16.msra.mxu1 %v7110_v35  ;;  %v4790_v46 = vpop.f32.mrb[15].mxu0  ;;  %5202 = vmatprep.subr.bf16.mxu0 %v7115_v36  ;;  %v7161_v32 = vld [vmem:[#allocation10 + $0x5c8] ss:$88 sps:$4 sm:$0xff]   ;;  %v7169_v35 = vld [vmem:[#allocation10 + $0x67c] ss:$88 sps:$4 sm:$0xff]  }
 0x420   :  { %v5373_v49 = vmax.f32 %v6285_v42, 0.0  ;;  %5288 = vmatprep.subr.bf16.mxu1 %v7118_v38  ;;  %v7172_v36 = vld [vmem:[#allocation10 + $0x7e4] ss:$88 sps:$4 sm:$0xff]   ;;  %v7167_v37 = vld [vmem:[#allocation10 + $0x678] ss:$88 sps:$4 sm:$0xff]  }
 0x421   :  { %5112 = vmatmul.mubr.bf16.vlgmr.msra.gmra.mrb[20].mxu0 %v7628_v23  ;;  %v7170_v38 = vld [vmem:[#allocation10 + $0x7e0] ss:$88 sps:$4 sm:$0xff]   ;;  %v7175_v40 = vld [vmem:[#allocation10 + $0x72c] ss:$88 sps:$4 sm:$0xff]   ;;  %v7176_v43 = vld [vmem:[#allocation10 + $0x890] ss:$88 sps:$4 sm:$0xff]  }
 0x422   :  { %v5428_v54 = vcombine.low %v5372_v45, %v5373_v49  ;;  %5203 = vmatpush1.bf16.msra.mxu0 %v7113_v44  ;;  %5234 = vmatprep.mubr.bf16.mxu0 %v7618_v5  ;;  %v7136_v5 = vld [vmem:[#allocation10 + $0x3c4] ss:$88 sps:$4 sm:$0xff]   ;;  %v7178_v41 = vld [vmem:[#allocation10 + $0x894] ss:$88 sps:$4 sm:$0xff]   ;;  %v7173_v42 = vld [vmem:[#allocation10 + $0x728] ss:$88 sps:$4 sm:$0xff]  }
 0x423   :  { %5289 = vmatpush1.bf16.msra.mxu1 %v7116_v47  ;;  %5204 = vmatprep.subr.bf16.mxu0 %v7121_v48  ;;  %v7181_v44 = vld [vmem:[#allocation10 + $0x7dc] ss:$88 sps:$4 sm:$0xff]   ;;  %v7179_v46 = vld [vmem:[#allocation10 + $0x7d8] ss:$88 sps:$4 sm:$0xff]   ;;  %v7187_v48 = vld [vmem:[#allocation10 + $0x88c] ss:$88 sps:$4 sm:$0xff]  }
 0x424   :  { %v5442_v60 = vrot.slane %v5428_v54, %v7687_v9  ;;  %5290 = vmatprep.subr.bf16.mxu1 %v7124_v50  ;;  %v7184_v45 = vld [vmem:[#allocation10 + $0x944] ss:$88 sps:$4 sm:$0xff]   ;;  %v7182_v47 = vld [vmem:[#allocation10 + $0x940] ss:$88 sps:$4 sm:$0xff]   ;;  %v7190_v49 = vld [vmem:[#allocation10 + $0x9f4] ss:$88 sps:$4 sm:$0xff]  }
 0x425   :  { %v7185_v50 = vld [vmem:[#allocation10 + $0x888] ss:$88 sps:$4 sm:$0xff]  }
 0x426   :  { %v5443_v63 = vcombine.low %v5435_v59, %v5442_v60  ;;  %5205 = vmatpush1.bf16.msra.mxu0 %v7119_v56  ;;  %v7188_v54 = vld [vmem:[#allocation10 + $0x9f0] ss:$88 sps:$4 sm:$0xff]   ;;  %v7193_v56 = vld [vmem:[#allocation10 + $0x93c] ss:$88 sps:$4 sm:$0xff]   ;;  %v7194_v59 = vld [vmem:[#allocation10 + $0xaa0] ss:$88 sps:$4 sm:$0xff]  }
 0x427   :  { %5291 = vmatpush1.bf16.msra.mxu1 %v7122_v57  ;;  %5206 = vmatprep.subr.bf16.mxu0 %v7127_v58  ;;  %v7196_v57 = vld [vmem:[#allocation10 + $0xaa4] ss:$88 sps:$4 sm:$0xff]   ;;  %v7191_v58 = vld [vmem:[#allocation10 + $0x938] ss:$88 sps:$4 sm:$0xff]  }
 0x428   :  { %5510 = vst [vmem:[%s7782_s7 + $0x8] sm:$0xff] %v5443_v63  ;;  %5292 = vmatprep.subr.bf16.mxu1 %v7130_v62  ;;  %v7199_v60 = vld [vmem:[#allocation10 + $0x9ec] ss:$88 sps:$4 sm:$0xff]   ;;  %v7197_v63 = vld [vmem:[#allocation10 + $0x9e8] ss:$88 sps:$4 sm:$0xff]  }
 0x429   :  { %v7202_v62 = vld [vmem:[#allocation10 + $0xb54] ss:$88 sps:$4 sm:$0xff]  }
 0x42a   :  { %5207 = vmatpush1.bf16.msra.mxu0 %v7125_v2  ;;  %v7200_v2 = vld [vmem:[#allocation10 + $0xb50] ss:$88 sps:$4 sm:$0xff]  }
 0x42b   :  { %5293 = vmatpush1.bf16.msra.mxu1 %v7128_v6  ;;  %5208 = vmatprep.subr.bf16.mxu0 %v7133_v3  ;;  %v7205_v6 = vld [vmem:[#allocation10 + $0xa9c] ss:$88 sps:$4 sm:$0xff]  }
 0x42c   :  { %5294 = vmatprep.subr.bf16.mxu1 %v7136_v5  ;;  %v7208_v3 = vld [vmem:[#allocation10 + $0xc04] ss:$88 sps:$4 sm:$0xff]   ;;  %v7203_v5 = vld [vmem:[#allocation10 + $0xa98] ss:$88 sps:$4 sm:$0xff]  }
 0x42e   :  { %5209 = vmatpush1.bf16.msra.mxu0 %v7131_v4  ;;  %v7206_v4 = vld [vmem:[#allocation10 + $0xc00] ss:$88 sps:$4 sm:$0xff]  }
 0x42f   :  { %5295 = vmatpush1.bf16.msra.mxu1 %v7134_v51  ;;  %5210 = vmatprep.subr.bf16.mxu0 %v7139_v7  ;;  %v7211_v51 = vld [vmem:[#allocation10 + $0xb4c] ss:$88 sps:$4 sm:$0xff]  }
 0x430   :  { %5296 = vmatprep.subr.bf16.mxu1 %v7142_v10  ;;  %v7214_v7 = vld [vmem:[#allocation10 + $0xcb4] ss:$88 sps:$4 sm:$0xff]   ;;  %v7209_v10 = vld [vmem:[#allocation10 + $0xb48] ss:$88 sps:$4 sm:$0xff]  }
 0x432   :  { %5211 = vmatpush1.bf16.msra.mxu0 %v7137_v11  ;;  %v7212_v11 = vld [vmem:[#allocation10 + $0xcb0] ss:$88 sps:$4 sm:$0xff]  }
 0x433   :  { %5297 = vmatpush1.bf16.msra.mxu1 %v7140_v12  ;;  %5212 = vmatprep.subr.bf16.mxu0 %v7145_v13  ;;  %v7217_v12 = vld [vmem:[#allocation10 + $0xbfc] ss:$88 sps:$4 sm:$0xff]  }
 0x434   :  { %5298 = vmatprep.subr.bf16.mxu1 %v7148_v15  ;;  %v7220_v13 = vld [vmem:[#allocation10 + $0xd64] ss:$88 sps:$4 sm:$0xff]   ;;  %v7215_v15 = vld [vmem:[#allocation10 + $0xbf8] ss:$88 sps:$4 sm:$0xff]  }
 0x436   :  { %5213 = vmatpush1.bf16.msra.mxu0 %v7143_v16  ;;  %v7218_v16 = vld [vmem:[#allocation10 + $0xd60] ss:$88 sps:$4 sm:$0xff]  }
 0x437   :  { %5299 = vmatpush1.bf16.msra.mxu1 %v7146_v17  ;;  %5214 = vmatprep.subr.bf16.mxu0 %v7151_v19  ;;  %v7223_v17 = vld [vmem:[#allocation10 + $0xcac] ss:$88 sps:$4 sm:$0xff]  }
 0x438   :  { %5300 = vmatprep.subr.bf16.mxu1 %v7154_v22  ;;  %v7226_v19 = vld [vmem:[#allocation10 + $0xe14] ss:$88 sps:$4 sm:$0xff]   ;;  %v7221_v22 = vld [vmem:[#allocation10 + $0xca8] ss:$88 sps:$4 sm:$0xff]  }
 0x43a   :  { %5215 = vmatpush1.bf16.msra.mxu0 %v7149_v25  ;;  %v7224_v25 = vld [vmem:[#allocation10 + $0xe10] ss:$88 sps:$4 sm:$0xff]  }
 0x43b   :  { %5301 = vmatpush1.bf16.msra.mxu1 %v7152_v26  ;;  %5216 = vmatprep.subr.bf16.mxu0 %v7157_v27  ;;  %v7229_v26 = vld [vmem:[#allocation10 + $0xd5c] ss:$88 sps:$4 sm:$0xff]  }
 0x43c   :  { %5302 = vmatprep.subr.bf16.mxu1 %v7160_v28  ;;  %v7232_v27 = vld [vmem:[#allocation10 + $0xec4] ss:$88 sps:$4 sm:$0xff]  }
 0x43d   :  { %v7235_v28 = vld [vmem:[#allocation10 + $0xe0c] ss:$88 sps:$4 sm:$0xff]  }
 0x43e   :  { %5217 = vmatpush1.bf16.msra.mxu0 %v7155_v39  ;;  %v7238_v39 = vld [vmem:[#allocation10 + $0xf74] ss:$88 sps:$4 sm:$0xff]  }
 0x43f   :  { %5303 = vmatpush1.bf16.msra.mxu1 %v7158_v29  ;;  %5218 = vmatprep.subr.bf16.mxu0 %v7163_v30  ;;  %v7233_v29 = vld [vmem:[#allocation10 + $0xe08] ss:$88 sps:$4 sm:$0xff]  }
 0x440   :  { %5304 = vmatprep.subr.bf16.mxu1 %v7166_v31  ;;  %v7236_v30 = vld [vmem:[#allocation10 + $0xf70] ss:$88 sps:$4 sm:$0xff]   ;;  %v7241_v31 = vld [vmem:[#allocation10 + $0xebc] ss:$88 sps:$4 sm:$0xff]  }
 0x442   :  { %5219 = vmatpush1.bf16.msra.mxu0 %v7161_v32  ;;  %v7244_v32 = vld [vmem:[#allocation10 + $0x1024] ss:$88 sps:$4 sm:$0xff]  }
 0x443   :  { %5305 = vmatpush1.bf16.msra.mxu1 %v7164_v33  ;;  %5220 = vmatprep.subr.bf16.mxu0 %v7169_v35  ;;  %v7239_v33 = vld [vmem:[#allocation10 + $0xeb8] ss:$88 sps:$4 sm:$0xff]  }
 0x444   :  { %5306 = vmatprep.subr.bf16.mxu1 %v7172_v36  ;;  %v7242_v35 = vld [vmem:[#allocation10 + $0x1020] ss:$88 sps:$4 sm:$0xff]   ;;  %v7247_v36 = vld [vmem:[#allocation10 + $0xf6c] ss:$88 sps:$4 sm:$0xff]  }
 0x446   :  { %5221 = vmatpush1.bf16.msra.mxu0 %v7167_v37  ;;  %v7250_v37 = vld [vmem:[#allocation10 + $0x10d4] ss:$88 sps:$4 sm:$0xff]  }
 0x447   :  { %5307 = vmatpush1.bf16.msra.mxu1 %v7170_v38  ;;  %5222 = vmatprep.subr.bf16.mxu0 %v7175_v40  ;;  %v7245_v38 = vld [vmem:[#allocation10 + $0xf68] ss:$88 sps:$4 sm:$0xff]  }
 0x448   :  { %5308 = vmatprep.subr.bf16.mxu1 %v7178_v41  ;;  %v7248_v40 = vld [vmem:[#allocation10 + $0x10d0] ss:$88 sps:$4 sm:$0xff]   ;;  %v7253_v41 = vld [vmem:[#allocation10 + $0x101c] ss:$88 sps:$4 sm:$0xff]  }
 0x44a   :  { %5223 = vmatpush1.bf16.msra.mxu0 %v7173_v42  ;;  %v7256_v42 = vld [vmem:[#allocation10 + $0x1184] ss:$88 sps:$4 sm:$0xff]  }
 0x44b   :  { %5309 = vmatpush1.bf16.msra.mxu1 %v7176_v43  ;;  %5224 = vmatprep.subr.bf16.mxu0 %v7181_v44  ;;  %v7251_v43 = vld [vmem:[#allocation10 + $0x1018] ss:$88 sps:$4 sm:$0xff]  }
 0x44c   :  { %5310 = vmatprep.subr.bf16.mxu1 %v7184_v45  ;;  %v7254_v44 = vld [vmem:[#allocation10 + $0x1180] ss:$88 sps:$4 sm:$0xff]   ;;  %v7259_v45 = vld [vmem:[#allocation10 + $0x10cc] ss:$88 sps:$4 sm:$0xff]  }
 0x44e   :  { %5225 = vmatpush1.bf16.msra.mxu0 %v7179_v46  ;;  %v7262_v46 = vld [vmem:[#allocation10 + $0x1234] ss:$88 sps:$4 sm:$0xff]  }
 0x44f   :  { %5311 = vmatpush1.bf16.msra.mxu1 %v7182_v47  ;;  %5226 = vmatprep.subr.bf16.mxu0 %v7187_v48  ;;  %v1431_v47 = vrot.slane %v7703_v1, %v7669_v21  ;;  %v7257_v48 = vld [vmem:[#allocation10 + $0x10c8] ss:$88 sps:$4 sm:$0xff]  }
 0x450   :  { %5312 = vmatprep.subr.bf16.mxu1 %v7190_v49  ;;  %v1435_v49 = vrot.slane %v7703_v1, %v7672_v24 }
 0x452   :  { %5227 = vmatpush1.bf16.msra.mxu0 %v7185_v50  ;;  %v7260_v50 = vld [vmem:[#allocation10 + $0x1230] ss:$88 sps:$4 sm:$0xff]  }
 0x453   :  { %5313 = vmatpush1.bf16.msra.mxu1 %v7188_v54  ;;  %5228 = vmatprep.subr.bf16.mxu0 %v7193_v56  ;;  %v7265_v54 = vld [vmem:[#allocation10 + $0x117c] ss:$88 sps:$4 sm:$0xff]  }
 0x454   :  { %5314 = vmatprep.subr.bf16.mxu1 %v7196_v57 }
 0x456   :  { %5229 = vmatpush1.bf16.msra.mxu0 %v7191_v58 }
 0x457   :  { %5315 = vmatpush1.bf16.msra.mxu1 %v7194_v59  ;;  %5230 = vmatprep.subr.bf16.mxu0 %v7199_v60  ;;  %v7263_v59 = vld [vmem:[#allocation10 + $0x1178] ss:$88 sps:$4 sm:$0xff]  }
 0x458   :  { %5325 = vmatprep.subr.bf16.mxu1 %v7202_v62 }
 0x45a   :  { %5317 = vmatmul.mubr.bf16.vlgmr.msra.gmra.mrb[32].mxu1 %v7621_v8  ;;  %5231 = vmatpush1.bf16.msra.mxu0 %v7197_v63  ;;  %v7268_v63 = vld [vmem:[#allocation10 + $0x122c] ss:$88 sps:$4 sm:$0xff]  }
 0x45b   :  { %5326 = vmatpush1.bf16.msra.mxu1 %v7200_v2  ;;  %6141 = vmatprep.mubr.msk.bf16.mxu1 %vm4460_vm2, %v7626_v20 }
 0x45c   :  { %5232 = vmatprep.subr.bf16.mxu0 %v7205_v6  ;;  %5327 = vmatprep.subr.bf16.mxu1 %v7208_v3 }
 0x45e   :  { %5233 = vmatpush1.bf16.msra.mxu0 %v7203_v5  ;;  %v1423_v5 = vrot.slane %v7703_v1, %v7612_v61 }
 0x45f   :  { %5328 = vmatpush1.bf16.msra.mxu1 %v7206_v4  ;;  %5243 = vmatprep.subr.bf16.mxu0 %v7211_v51  ;;  %v1427_v4 = vrot.slane %v7703_v1, %v7615_v0  ;;  %v7266_v51 = vld [vmem:[#allocation10 + $0x1228] ss:$88 sps:$4 sm:$0xff]  }
 0x460   :  { %5329 = vmatprep.subr.bf16.mxu1 %v7214_v7 }
 0x461   :  { %5235 = vmatmul.mubr.bf16.vlgmr.msra.gmra.mrb[24].mxu0 %v7621_v8  ;;  %v7227_v8 = vld [vmem:[#allocation10 + $0xd58] ss:$88 sps:$4 sm:$0xff]  }
 0x462   :  { %5244 = vmatpush1.bf16.msra.mxu0 %v7209_v10  ;;  %6140 = vmatprep.mubr.msk.bf16.mxu0 %vm4460_vm2, %v7626_v20  ;;  %v7230_v20 = vld [vmem:[#allocation10 + $0xec0] ss:$88 sps:$4 sm:$0xff]  }
 0x463   :  { %5330 = vmatpush1.bf16.msra.mxu1 %v7212_v11  ;;  %5245 = vmatprep.subr.bf16.mxu0 %v7217_v12 }
 0x464   :  { %5331 = vmatprep.subr.bf16.mxu1 %v7220_v13 }
 0x466   :  { %5246 = vmatpush1.bf16.msra.mxu0 %v7215_v15 }
 0x467   :  { %5332 = vmatpush1.bf16.msra.mxu1 %v7218_v16  ;;  %5247 = vmatprep.subr.bf16.mxu0 %v7223_v17 }
 0x468   :  { %5333 = vmatprep.subr.bf16.mxu1 %v7226_v19 }
 0x46a   :  { %5248 = vmatpush1.bf16.msra.mxu0 %v7221_v22 }
 0x46b   :  { %5334 = vmatpush1.bf16.msra.mxu1 %v7224_v25  ;;  %5249 = vmatprep.subr.bf16.mxu0 %v7229_v26  ;;  %v5452_v25 = vrot.slane %v7716_v34, %v7687_v9 }
 0x46c   :  { %5335 = vmatprep.subr.bf16.mxu1 %v7232_v27 }
 0x46e   :  { %5250 = vmatpush1.bf16.msra.mxu0 %v7227_v8  ;;  %v1376_v8 = vld [vmem:[#allocation12 + $0x10] sm:$0x3f] }
 0x46f   :  { %5336 = vmatpush1.bf16.msra.mxu1 %v7230_v20  ;;  %5251 = vmatprep.subr.bf16.mxu0 %v7235_v28  ;;  %v1447_v20 = vrot.slane %v1376_v8, %v7604_v53  ;;  %v1451_v28 = vrot.slane %v1376_v8, %v7607_v55  ;;  %v1463_v52 = vrot.slane %v1376_v8, %v7669_v21 }
 0x470   :  { %5337 = vmatprep.subr.bf16.mxu1 %v7238_v39 }
 0x472   :  { %5252 = vmatpush1.bf16.msra.mxu0 %v7233_v29 }
 0x473   :  { %5338 = vmatpush1.bf16.msra.mxu1 %v7236_v30  ;;  %5253 = vmatprep.subr.bf16.mxu0 %v7241_v31 }
 0x474   :  { %5339 = vmatprep.subr.bf16.mxu1 %v7244_v32 }
 0x476   :  { %5254 = vmatpush1.bf16.msra.mxu0 %v7239_v33 }
 0x477   :  { %5340 = vmatpush1.bf16.msra.mxu1 %v7242_v35  ;;  %5255 = vmatprep.subr.bf16.mxu0 %v7247_v36  ;;  %v1439_v35 = vrot.slane %v7703_v1, %v1406_v14  ;;  %v1443_v36 = vrot.slane %v7703_v1, %v1410_v18  ;;  %v1467_v1 = vrot.slane %v1376_v8, %v7672_v24 }
 0x478   :  { %5341 = vmatprep.subr.bf16.mxu1 %v7250_v37 }
 0x47a   :  { %5256 = vmatpush1.bf16.msra.mxu0 %v7245_v38 }
 0x47b   :  { %5342 = vmatpush1.bf16.msra.mxu1 %v7248_v40  ;;  %5257 = vmatprep.subr.bf16.mxu0 %v7253_v41 }
 0x47c   :  { %5343 = vmatprep.subr.bf16.mxu1 %v7256_v42 }
 0x47e   :  { %5258 = vmatpush1.bf16.msra.mxu0 %v7251_v43 }
 0x47f   :  { %5344 = vmatpush1.bf16.msra.mxu1 %v7254_v44  ;;  %5259 = vmatprep.subr.bf16.mxu0 %v7259_v45 }
 0x480   :  { %5345 = vmatprep.subr.bf16.mxu1 %v7262_v46 }
 0x481   :  { %v5031_v56 = vpop.f32.mrb[24].mxu1 }
 0x482   :  { %v6290_v57 = vadd.f32 %v5031_v56, %v1431_v47  ;;  %v5033_v58 = vpop.f32.mrb[25].mxu1  ;;  %5260 = vmatpush1.bf16.msra.mxu0 %v7257_v48 }
 0x483   :  { %v6291_v60 = vadd.f32 %v5033_v58, %v1435_v49  ;;  %v5035_v62 = vpop.f32.mrb[26].mxu1  ;;  %5346 = vmatpush1.bf16.msra.mxu1 %v7260_v50  ;;  %5261 = vmatprep.subr.bf16.mxu0 %v7265_v54 }
 0x484   :  { %v5378_v2 = vmax.f32 %v6290_v57, 0.0  ;;  %v5036_v6 = vpop.f32.mrb[27].mxu1 }
 0x485   :  { %v5379_v3 = vmax.f32 %v6291_v60, 0.0  ;;  %v1459_v60 = vrot.slane %v1376_v8, %v7615_v0 }
 0x486   :  { %5358 = vmatmul.mubr.bf16.vlgmr.msra.gmra.mrb[32].mxu1 %v7628_v23  ;;  %5262 = vmatpush1.bf16.msra.mxu0 %v7263_v59  ;;  %v1455_v59 = vrot.slane %v1376_v8, %v7612_v61 }
 0x487   :  { %v5461_v7 = vcombine.low %v5378_v2, %v5379_v3  ;;  %5263 = vmatprep.subr.bf16.mxu0 %v7268_v63 }
 0x488   :  { %v4949_v10 = vpop.f32.mrb[16].mxu0 }
 0x489   :  { %v6288_v11 = vadd.f32 %v4949_v10, %v1423_v5  ;;  %v4951_v12 = vpop.f32.mrb[17].mxu0  ;;  %v5469_v46 = vrot.slane %v5461_v7, %v7687_v9 }
 0x48a   :  { %v6289_v13 = vadd.f32 %v4951_v12, %v1427_v4  ;;  %v4953_v15 = vpop.f32.mrb[18].mxu0  ;;  %5264 = vmatpush1.bf16.msra.mxu0 %v7266_v51 }
 0x48b   :  { %v5376_v16 = vmax.f32 %v6288_v11, 0.0  ;;  %v4954_v17 = vpop.f32.mrb[19].mxu0 }
 0x48c   :  { %v5377_v19 = vmax.f32 %v6289_v13, 0.0 }
 0x48d   :  { %5276 = vmatmul.mubr.bf16.vlgmr.msra.gmra.mrb[24].mxu0 %v7628_v23 }
 0x48e   :  { %v5445_v22 = vcombine.low %v5376_v16, %v5377_v19 }
 0x490   :  { %v5459_v26 = vrot.slane %v5445_v22, %v7687_v9 }
 0x492   :  { %v5460_v27 = vcombine.low %v5452_v25, %v5459_v26 }
 0x494   :  { %5511 = vst [vmem:[%s7782_s7 + $0x10] sm:$0xff] %v5460_v27 }
 0x4ed   :  { %v5195_v39 = vpop.f32.mrb[28].mxu1 }
 0x4ee   :  { %v6294_v29 = vadd.f32 %v5195_v39, %v1447_v20  ;;  %v5197_v30 = vpop.f32.mrb[29].mxu1 }
 0x4ef   :  { %v6295_v23 = vadd.f32 %v5197_v30, %v1451_v28  ;;  %v5199_v31 = vpop.f32.mrb[30].mxu1 }
 0x4f0   :  { %v5382_v32 = vmax.f32 %v6294_v29, 0.0  ;;  %v5200_v33 = vpop.f32.mrb[31].mxu1 }
 0x4f1   :  { %v5383_v34 = vmax.f32 %v6295_v23, 0.0 }
 0x4f3   :  { %v5478_v37 = vcombine.low %v5382_v32, %v5383_v34 }
 0x4f4   :  { %v5113_v53 = vpop.f32.mrb[20].mxu0 }
 0x4f5   :  { %v6292_v38 = vadd.f32 %v5113_v53, %v1439_v35  ;;  %v5115_v55 = vpop.f32.mrb[21].mxu0  ;;  %v5486_v61 = vrot.slane %v5478_v37, %v7687_v9 }
 0x4f6   :  { %v6293_v40 = vadd.f32 %v5115_v55, %v1443_v36  ;;  %v5117_v41 = vpop.f32.mrb[22].mxu0 }
 0x4f7   :  { %v5380_v42 = vmax.f32 %v6292_v38, 0.0  ;;  %v5118_v43 = vpop.f32.mrb[23].mxu0 }
 0x4f8   :  { %v5381_v44 = vmax.f32 %v6293_v40, 0.0 }
 0x4fa   :  { %v5462_v45 = vcombine.low %v5380_v42, %v5381_v44 }
 0x4fc   :  { %v5476_v47 = vrot.slane %v5462_v45, %v7687_v9 }
 0x4fe   :  { %v5477_v48 = vcombine.low %v5469_v46, %v5476_v47 }
 0x500   :  { %5512 = vst [vmem:[%s7782_s7 + $0x18] sm:$0xff] %v5477_v48 }
 0x559   :  { %v5359_v14 = vpop.f32.mrb[32].mxu1 }
 0x55a   :  { %v6298_v18 = vadd.f32 %v5359_v14, %v1463_v52  ;;  %v5361_v49 = vpop.f32.mrb[33].mxu1 }
 0x55b   :  { %v6299_v50 = vadd.f32 %v5361_v49, %v1467_v1  ;;  %v5363_v54 = vpop.f32.mrb[34].mxu1 }
 0x55c   :  { %v5386_v56 = vmax.f32 %v6298_v18, 0.0  ;;  %v5364_v57 = vpop.f32.mrb[35].mxu1 }
 0x55d   :  { %v5387_v58 = vmax.f32 %v6299_v50, 0.0 }
 0x55f   :  { %v5495_v62 = vcombine.low %v5386_v56, %v5387_v58 }
 0x560   :  { %v5277_v63 = vpop.f32.mrb[24].mxu0 }
 0x561   :  { %v5502_v21 = vrot.slane %v5495_v62, %v7687_v9  ;;  %v6296_v24 = vadd.f32 %v5277_v63, %v1455_v59  ;;  %v5279_v2 = vpop.f32.mrb[25].mxu0 }
 0x562   :  { %v6297_v6 = vadd.f32 %v5279_v2, %v1459_v60  ;;  %v5281_v3 = vpop.f32.mrb[26].mxu0 }
 0x563   :  { %5517 = vst.msk [vmem:[%s7782_s7 + $0x28] sm:$0xf] %vm5516_vm5, %v5502_v21  ;;  %v5384_v5 = vmax.f32 %v6296_v24, 0.0  ;;  %v5282_v4 = vpop.f32.mrb[27].mxu0 }
 0x564   :  { %v5385_v51 = vmax.f32 %v6297_v6, 0.0 }
 0x566   :  { %v5479_v7 = vcombine.low %v5384_v5, %v5385_v51 }
 0x568   :  { %v5493_v0 = vrot.slane %v5479_v7, %v7687_v9 }
 0x56a   :  { %v5494_v10 = vcombine.low %v5486_v61, %v5493_v0 }
 0x56c   :  { %5513 = vst [vmem:[%s7782_s7 + $0x20] sm:$0xff] %v5494_v10 }
 0x56d   :  { %5522 = vsyncpa [#allocation3], 1 }
 0x56e   :  { %5523 = vsyncpa [#allocation5], 1 }
 0x56f   :  { %5524 = vsyncpa [#allocation8], 1 }
 0x570   :  { %5525 = vsyncpa [#allocation11], 1 }

</bundles_post_ra>
